<compile_context>
chip_gen: v7x
topology: tpu7x:2x2x1
jax: 0.10.0
libtpu: 0.0.40
codegen_flags: <defaults>
</compile_context>

<pallas_src>
import jax
import jax.numpy as jnp
import numpy as np
from jax.experimental import pallas as pl
from jax.experimental.pallas import tpu as pltpu

# ---- static configuration -------------------------------------------------
T = 8            # sequence length
B = 2            # batch size
D_TRAJ = 11      # local_traj feature dim
D_CTX = 5        # context_dim
D_IN = D_TRAJ + D_CTX
H1 = 32          # in_mlp hidden
HG = 16          # GRU hidden per direction (bi-dir -> 2*HG)
H_RNN = 2 * HG
H_OUT = 32       # out_mlp hidden
NZ = 8           # latent dim


# ---- Pallas kernel ---------------------------------------------------------
def data_encoder_kernel(
    xc_ref,                                  # (T*B, 2*D_IN)  = [x | x_time_reversed]
    eps_ref,                                 # (B, NZ)
    w1c_ref, b1c_ref,                        # in_mlp, block-diag (applied to both copies)
    wihc_ref, bgic_ref,                      # hoisted input->hidden proj, both directions
    whh_r_ref, whh_z_ref, whh_n_ref, bhn_ref,  # block-diag per-gate hidden-hidden weights
    wof_ref, wob_ref, bo_ref,                # out_mlp (zero-padded per direction)
    wq_ref, bq_ref,                          # q_z_net
    out_ref,                                 # (B, 3*NZ) = [mu | logvar | samp]
):
    f32 = jnp.float32
    xc = xc_ref[...]                                                   # (T*B, 2*D_IN)

    # --- batched in_mlp over all timesteps, both time orders (single dot) ---
    x2c = jnp.tanh(jnp.dot(xc, w1c_ref[...], preferred_element_type=f32)
                   + b1c_ref[...])                                     # (T*B, 2*H1)

    # --- hoisted input->hidden GRU projection for BOTH directions (single dot) ---
    # Columns pre-ordered [r_f|r_b|z_f|z_b|n_f|n_b]; bgic already holds
    # bih + bhh for r,z (bhh_n applied inside the loop, per PyTorch GRU).
    gic = jnp.dot(x2c, wihc_ref[...], preferred_element_type=f32) + bgic_ref[...]

    # One-time contiguous lane splits (outside the recurrent loop).
    a_r = gic[:, 0 * H_RNN:1 * H_RNN]                                  # (T*B, 2*HG)
    a_z = gic[:, 1 * H_RNN:2 * H_RNN]
    a_n = gic[:, 2 * H_RNN:3 * H_RNN]

    whh_r, whh_z, whh_n = whh_r_ref[...], whh_z_ref[...], whh_n_ref[...]
    bhn = bhn_ref[...]

    def rows(a, t):
        # static sublane slice for timestep t of a t-major (T*B, .) array
        return a[t * B:(t + 1) * B, :]

    # --- fused bi-directional recurrence: state = [h_fwd(t=k) | h_bwd(t=T-1-k)] ---
    h = jnp.zeros((B, H_RNN), f32)
    cs = [None] * T
    for k in range(T):
        gh_r = jnp.dot(h, whh_r, preferred_element_type=f32)
        gh_z = jnp.dot(h, whh_z, preferred_element_type=f32)
        gh_n = jnp.dot(h, whh_n, preferred_element_type=f32) + bhn
        r = jax.nn.sigmoid(rows(a_r, k) + gh_r)
        z = jax.nn.sigmoid(rows(a_z, k) + gh_z)
        n = jnp.tanh(rows(a_n, k) + r * gh_n)
        h = (1.0 - z) * n + z * h
        cs[k] = h

    # --- batched out_mlp (two dots; no per-step lane slicing / concat) ---
    # cs[k] = [hf_k | hb_{T-1-k}].  wof is zero in its bottom HG rows and wob in its top
    # HG rows, so (cs in forward order) @ wof picks hf_t and (cs in reversed order) @ wob
    # picks hb_t, re-pairing the directions purely via MXU.
    call = jnp.concatenate(cs, axis=0)                                 # (T*B, 2*HG)
    crev = jnp.concatenate(cs[::-1], axis=0)                           # (T*B, 2*HG)
    y = jnp.tanh(jnp.dot(call, wof_ref[...], preferred_element_type=f32)
                 + jnp.dot(crev, wob_ref[...], preferred_element_type=f32)
                 + bo_ref[...])                                        # (T*B, H_OUT)

    # --- mean pooling over time (dim 0) ---
    acc = rows(y, 0)
    for t in range(1, T):
        acc = acc + rows(y, t)
    pooled = acc * (1.0 / T)                                           # (B, H_OUT)

    # --- q_z_net + Normal.rsample() ---
    qz = jnp.dot(pooled, wq_ref[...], preferred_element_type=f32) + bq_ref[...]
    mu = qz[:, :NZ]
    logvar = qz[:, NZ:]
    samp = mu + eps_ref[...] * jnp.exp(0.5 * logvar)

    # Single lane-packed output store; split in the JAX wrapper.
    out_ref[...] = jnp.concatenate([mu, logvar, samp], axis=-1)


def data_encoder_forward(x_in, eps, params):
    """x_in: (T, B, D_IN) float32; eps: (B, NZ); params: tuple of 14 weight arrays
    in the PyTorch-like packed layout (gates [r|z|n])."""
    (w1, b1, wih_f, whh_f, bih_f, bhh_f,
     wih_b, whh_b, bih_b, bhh_b, wo, bo, wq, bq) = params
    f32 = jnp.float32

    def zeros(r, c):
        return jnp.zeros((r, c), f32)

    # in_mlp block-diagonal weight: [x | x_rev] -> [x2_fwd | x2_rev]
    w1c = jnp.concatenate([
        jnp.concatenate([w1, zeros(D_IN, H1)], axis=1),
        jnp.concatenate([zeros(D_IN, H1), w1], axis=1)], axis=0)       # (2*D_IN, 2*H1)
    b1c = jnp.concatenate([b1, b1], axis=1)                            # (1, 2*H1)

    # Combined input->hidden projection.  Column order [r_f|r_b|z_f|z_b|n_f|n_b]; the
    # fwd columns read only the top H1 rows (x2 fwd), the bwd columns only the bottom H1
    # rows (x2 time-reversed).  bhh for the r,z gates is folded in; bhh_n stays separate
    # (it sits inside the r*(...) term of the GRU).
    wih_cols, bgi_cols = [], []
    for g in range(3):
        wf_g = wih_f[:, g * HG:(g + 1) * HG]
        wb_g = wih_b[:, g * HG:(g + 1) * HG]
        wih_cols.append(jnp.concatenate([
            jnp.concatenate([wf_g, zeros(H1, HG)], axis=1),
            jnp.concatenate([zeros(H1, HG), wb_g], axis=1)], axis=0))  # (2*H1, 2*HG)
        bf = bih_f[:, g * HG:(g + 1) * HG]
        bb = bih_b[:, g * HG:(g + 1) * HG]
        if g < 2:  # fold bhh for r, z gates
            bf = bf + bhh_f[:, g * HG:(g + 1) * HG]
            bb = bb + bhh_b[:, g * HG:(g + 1) * HG]
        bgi_cols.append(jnp.concatenate([bf, bb], axis=1))             # (1, 2*HG)
    wihc = jnp.concatenate(wih_cols, axis=1)                           # (2*H1, 3*2*HG)
    bgic = jnp.concatenate(bgi_cols, axis=1)                           # (1, 3*2*HG)

    # Block-diagonal per-gate hidden-hidden weights (fused fwd/bwd state of width 2*HG).
    def block_diag(wf_g, wb_g):
        return jnp.concatenate([
            jnp.concatenate([wf_g, zeros(HG, HG)], axis=1),
            jnp.concatenate([zeros(HG, HG), wb_g], axis=1)], axis=0)   # (2*HG, 2*HG)

    whh_r_c = block_diag(whh_f[:, :HG], whh_b[:, :HG])
    whh_z_c = block_diag(whh_f[:, HG:2 * HG], whh_b[:, HG:2 * HG])
    whh_n_c = block_diag(whh_f[:, 2 * HG:], whh_b[:, 2 * HG:])
    bhn_c = jnp.concatenate([bhh_f[:, 2 * HG:], bhh_b[:, 2 * HG:]], axis=1)  # (1, 2*HG)

    # out_mlp, zero-padded per direction so the kernel needs no lane slicing.
    wo_f_pad = jnp.concatenate([wo[:HG, :], zeros(HG, H_OUT)], axis=0)  # (2*HG, H_OUT)
    wo_b_pad = jnp.concatenate([zeros(HG, H_OUT), wo[HG:, :]], axis=0)  # (2*HG, H_OUT)

    x_fwd = x_in.reshape(T * B, D_IN)
    x_bwd = jnp.flip(x_in, axis=0).reshape(T * B, D_IN)
    xc = jnp.concatenate([x_fwd, x_bwd], axis=1)                        # (T*B, 2*D_IN)

    args = (xc, eps, w1c, b1c, wihc, bgic,
            whh_r_c, whh_z_c, whh_n_c, bhn_c,
            wo_f_pad, wo_b_pad, bo, wq, bq)
    vmem = pl.BlockSpec(memory_space=pltpu.MemorySpace.VMEM)
    out = pl.pallas_call(
        data_encoder_kernel,
        out_shape=jax.ShapeDtypeStruct((B, 3 * NZ), jnp.float32),
        in_specs=[vmem] * len(args),
        out_specs=vmem,
    )(*args)
    mu = out[:, :NZ]
    logvar = out[:, NZ:2 * NZ]
    samp = out[:, 2 * NZ:]
    return mu, logvar, samp


# ---- pure-JAX reference (for correctness check) ----------------------------
def reference_forward(x_in, eps, params):
    HI = jax.lax.Precision.HIGHEST
    (w1, b1, wih_f, whh_f, bih_f, bhh_f,
     wih_b, whh_b, bih_b, bhh_b, wo, bo, wq, bq) = params

    def dot(a, b):
        return jnp.dot(a, b, precision=HI)

    def in_mlp(xt):
        return jnp.tanh(dot(xt, w1) + b1)

    def gru(xt, h, wih, whh, bih, bhh):
        gi = dot(xt, wih) + bih
        gh = dot(h, whh) + bhh
        r = jax.nn.sigmoid(gi[:, :HG] + gh[:, :HG])
        z = jax.nn.sigmoid(gi[:, HG:2 * HG] + gh[:, HG:2 * HG])
        n = jnp.tanh(gi[:, 2 * HG:] + r * gh[:, 2 * HG:])
        return (1.0 - z) * n + z * h

    h = jnp.zeros((B, HG), jnp.float32)
    out_f = []
    for t in range(T):
        h = gru(in_mlp(x_in[t]), h, wih_f, whh_f, bih_f, bhh_f)
        out_f.append(h)
    h = jnp.zeros((B, HG), jnp.float32)
    out_b = [None] * T
    for t in range(T - 1, -1, -1):
        h = gru(in_mlp(x_in[t]), h, wih_b, whh_b, bih_b, bhh_b)
        out_b[t] = h
    rnn = jnp.stack([jnp.concatenate([out_f[t], out_b[t]], -1) for t in range(T)])
    y = jnp.tanh(dot(rnn, wo) + bo)
    pooled = y.mean(axis=0)
    qz = dot(pooled, wq) + bq
    mu, logvar = qz[:, :NZ], qz[:, NZ:]
    samp = mu + eps * jnp.exp(0.5 * logvar)
    return mu, logvar, samp


# ---- main ------------------------------------------------------------------
if __name__ == "__main__":
    key = jax.random.PRNGKey(0)
    keys = jax.random.split(key, 20)

    def init(k, shape, scale=0.3):
        return scale * jax.random.normal(k, shape, jnp.float32)

    params = (
        init(keys[0], (D_IN, H1)),       init(keys[1], (1, H1)),          # in_mlp
        init(keys[2], (H1, 3 * HG)),     init(keys[3], (HG, 3 * HG)),     # GRU fwd W_ih, W_hh
        init(keys[4], (1, 3 * HG)),      init(keys[5], (1, 3 * HG)),      # GRU fwd b_ih, b_hh
        init(keys[6], (H1, 3 * HG)),     init(keys[7], (HG, 3 * HG)),     # GRU bwd W_ih, W_hh
        init(keys[8], (1, 3 * HG)),      init(keys[9], (1, 3 * HG)),      # GRU bwd b_ih, b_hh
        init(keys[10], (H_RNN, H_OUT)),  init(keys[11], (1, H_OUT)),      # out_mlp
        init(keys[12], (H_OUT, 2 * NZ)), init(keys[13], (1, 2 * NZ)),     # q_z_net
    )

    local_traj = jax.random.normal(keys[14], (T, B, D_TRAJ), jnp.float32)   # data['local_traj_tp']
    context = jax.random.normal(keys[15], (T, B, D_CTX), jnp.float32)       # data['context']
    eps = jax.random.normal(keys[16], (B, NZ), jnp.float32)                 # rsample noise

    # input == 'local_traj':  x_in[0, :, [0, 1, -2, -1]] = x_in[1, :, [0, 1, -2, -1]]
    cols = jnp.array([0, 1, D_TRAJ - 2, D_TRAJ - 1])
    row0 = local_traj[0].at[:, cols].set(local_traj[1][:, cols])
    x_traj = local_traj.at[0].set(row0)
    # append_context == 'early'
    x_in = jnp.concatenate([x_traj, context], axis=-1)                       # (T, B, D_IN)

    mu, logvar, samp = data_encoder_forward(x_in, eps, params)
    jax.block_until_ready((mu, logvar, samp))

    mu_r, logvar_r, samp_r = reference_forward(x_in, eps, params)
    np.testing.assert_allclose(np.asarray(mu), np.asarray(mu_r), atol=1e-4, rtol=1e-4)
    np.testing.assert_allclose(np.asarray(logvar), np.asarray(logvar_r), atol=1e-4, rtol=1e-4)
    np.testing.assert_allclose(np.asarray(samp), np.asarray(samp_r), atol=1e-4, rtol=1e-4)

    print("KERNEL_OK")
</pallas_src>

<mosaic_0001>
module attributes {stable_mosaic.version = 11 : i64} {
  func.func @data_encoder_kernel(%arg0: memref<16x32xf32, #tpu.memory_space<vmem>>, %arg1: memref<2x8xf32, #tpu.memory_space<vmem>>, %arg2: memref<32x64xf32, #tpu.memory_space<vmem>>, %arg3: memref<1x64xf32, #tpu.memory_space<vmem>>, %arg4: memref<64x96xf32, #tpu.memory_space<vmem>>, %arg5: memref<1x96xf32, #tpu.memory_space<vmem>>, %arg6: memref<32x32xf32, #tpu.memory_space<vmem>>, %arg7: memref<32x32xf32, #tpu.memory_space<vmem>>, %arg8: memref<32x32xf32, #tpu.memory_space<vmem>>, %arg9: memref<1x32xf32, #tpu.memory_space<vmem>>, %arg10: memref<32x32xf32, #tpu.memory_space<vmem>>, %arg11: memref<32x32xf32, #tpu.memory_space<vmem>>, %arg12: memref<1x32xf32, #tpu.memory_space<vmem>>, %arg13: memref<32x16xf32, #tpu.memory_space<vmem>>, %arg14: memref<1x16xf32, #tpu.memory_space<vmem>>, %arg15: memref<2x24xf32, #tpu.memory_space<vmem>>) attributes {dimension_semantics = [], scalar_prefetch = 0 : i64, scratch_operands = 0 : i64, tpu.core_type = #tpu.core_type<tc>} {
    %c0 = arith.constant 0 : index
    %c0_0 = arith.constant 0 : index
    %0 = vector.load %arg0[%c0, %c0_0] : memref<16x32xf32, #tpu.memory_space<vmem>>, vector<16x32xf32>
    %c0_1 = arith.constant 0 : index
    %c0_2 = arith.constant 0 : index
    %1 = vector.load %arg2[%c0_1, %c0_2] : memref<32x64xf32, #tpu.memory_space<vmem>>, vector<32x64xf32>
    %cst = arith.constant dense<0.000000e+00> : vector<16x64xf32>
    %2 = tpu.matmul %0, %1, %cst {dimension_numbers = #tpu.dot_dimension_numbers<[1], [0], [0], [1], [0, 0, 1, 1], [], []>} : vector<16x32xf32>, vector<32x64xf32>, vector<16x64xf32> -> vector<16x64xf32>
    %c0_3 = arith.constant 0 : index
    %c0_4 = arith.constant 0 : index
    %3 = vector.load %arg3[%c0_3, %c0_4] : memref<1x64xf32, #tpu.memory_space<vmem>>, vector<1x64xf32>
    %4 = vector.broadcast %3 : vector<1x64xf32> to vector<16x64xf32>
    %5 = arith.addf %2, %4 : vector<16x64xf32>
    %6 = math.tanh %5 : vector<16x64xf32>
    %c0_5 = arith.constant 0 : index
    %c0_6 = arith.constant 0 : index
    %7 = vector.load %arg4[%c0_5, %c0_6] : memref<64x96xf32, #tpu.memory_space<vmem>>, vector<64x96xf32>
    %cst_7 = arith.constant dense<0.000000e+00> : vector<16x96xf32>
    %8 = tpu.matmul %6, %7, %cst_7 {dimension_numbers = #tpu.dot_dimension_numbers<[1], [0], [0], [1], [0, 0, 1, 1], [], []>} : vector<16x64xf32>, vector<64x96xf32>, vector<16x96xf32> -> vector<16x96xf32>
    %c0_8 = arith.constant 0 : index
    %c0_9 = arith.constant 0 : index
    %9 = vector.load %arg5[%c0_8, %c0_9] : memref<1x96xf32, #tpu.memory_space<vmem>>, vector<1x96xf32>
    %10 = vector.broadcast %9 : vector<1x96xf32> to vector<16x96xf32>
    %11 = arith.addf %8, %10 : vector<16x96xf32>
    %12 = vector.extract_strided_slice %11 {offsets = [0, 0], sizes = [16, 32], strides = [1, 1]} : vector<16x96xf32> to vector<16x32xf32>
    %13 = vector.extract_strided_slice %11 {offsets = [0, 32], sizes = [16, 32], strides = [1, 1]} : vector<16x96xf32> to vector<16x32xf32>
    %14 = vector.extract_strided_slice %11 {offsets = [0, 64], sizes = [16, 32], strides = [1, 1]} : vector<16x96xf32> to vector<16x32xf32>
    %c0_10 = arith.constant 0 : index
    %c0_11 = arith.constant 0 : index
    %15 = vector.load %arg6[%c0_10, %c0_11] : memref<32x32xf32, #tpu.memory_space<vmem>>, vector<32x32xf32>
    %c0_12 = arith.constant 0 : index
    %c0_13 = arith.constant 0 : index
    %16 = vector.load %arg7[%c0_12, %c0_13] : memref<32x32xf32, #tpu.memory_space<vmem>>, vector<32x32xf32>
    %c0_14 = arith.constant 0 : index
    %c0_15 = arith.constant 0 : index
    %17 = vector.load %arg8[%c0_14, %c0_15] : memref<32x32xf32, #tpu.memory_space<vmem>>, vector<32x32xf32>
    %c0_16 = arith.constant 0 : index
    %c0_17 = arith.constant 0 : index
    %18 = vector.load %arg9[%c0_16, %c0_17] : memref<1x32xf32, #tpu.memory_space<vmem>>, vector<1x32xf32>
    %cst_18 = arith.constant 0.000000e+00 : f32
    %19 = vector.broadcast %cst_18 : f32 to vector<2x32xf32>
    %cst_19 = arith.constant dense<0.000000e+00> : vector<2x32xf32>
    %20 = tpu.matmul %19, %15, %cst_19 {dimension_numbers = #tpu.dot_dimension_numbers<[1], [0], [0], [1], [0, 0, 1, 1], [], []>} : vector<2x32xf32>, vector<32x32xf32>, vector<2x32xf32> -> vector<2x32xf32>
    %cst_20 = arith.constant dense<0.000000e+00> : vector<2x32xf32>
    %21 = tpu.matmul %19, %16, %cst_20 {dimension_numbers = #tpu.dot_dimension_numbers<[1], [0], [0], [1], [0, 0, 1, 1], [], []>} : vector<2x32xf32>, vector<32x32xf32>, vector<2x32xf32> -> vector<2x32xf32>
    %cst_21 = arith.constant dense<0.000000e+00> : vector<2x32xf32>
    %22 = tpu.matmul %19, %17, %cst_21 {dimension_numbers = #tpu.dot_dimension_numbers<[1], [0], [0], [1], [0, 0, 1, 1], [], []>} : vector<2x32xf32>, vector<32x32xf32>, vector<2x32xf32> -> vector<2x32xf32>
    %23 = vector.broadcast %18 : vector<1x32xf32> to vector<2x32xf32>
    %24 = arith.addf %22, %23 : vector<2x32xf32>
    %25 = vector.extract_strided_slice %12 {offsets = [0, 0], sizes = [2, 32], strides = [1, 1]} : vector<16x32xf32> to vector<2x32xf32>
    %26 = arith.addf %25, %20 : vector<2x32xf32>
    %27 = arith.negf %26 : vector<2x32xf32>
    %28 = math.exp %27 : vector<2x32xf32>
    %cst_22 = arith.constant 1.000000e+00 : f32
    %29 = vector.broadcast %cst_22 : f32 to vector<2x32xf32>
    %30 = arith.addf %29, %28 : vector<2x32xf32>
    %31 = arith.divf %29, %30 : vector<2x32xf32>
    %32 = vector.extract_strided_slice %13 {offsets = [0, 0], sizes = [2, 32], strides = [1, 1]} : vector<16x32xf32> to vector<2x32xf32>
    %33 = arith.addf %32, %21 : vector<2x32xf32>
    %34 = arith.negf %33 : vector<2x32xf32>
    %35 = math.exp %34 : vector<2x32xf32>
    %cst_23 = arith.constant 1.000000e+00 : f32
    %36 = vector.broadcast %cst_23 : f32 to vector<2x32xf32>
    %37 = arith.addf %36, %35 : vector<2x32xf32>
    %38 = arith.divf %36, %37 : vector<2x32xf32>
    %39 = vector.extract_strided_slice %14 {offsets = [0, 0], sizes = [2, 32], strides = [1, 1]} : vector<16x32xf32> to vector<2x32xf32>
    %40 = arith.mulf %31, %24 : vector<2x32xf32>
    %41 = arith.addf %39, %40 : vector<2x32xf32>
    %42 = math.tanh %41 : vector<2x32xf32>
    %cst_24 = arith.constant 1.000000e+00 : f32
    %43 = vector.broadcast %cst_24 : f32 to vector<2x32xf32>
    %44 = arith.subf %43, %38 : vector<2x32xf32>
    %45 = arith.mulf %44, %42 : vector<2x32xf32>
    %46 = arith.mulf %38, %19 : vector<2x32xf32>
    %47 = arith.addf %45, %46 : vector<2x32xf32>
    %cst_25 = arith.constant dense<0.000000e+00> : vector<2x32xf32>
    %48 = tpu.matmul %47, %15, %cst_25 {dimension_numbers = #tpu.dot_dimension_numbers<[1], [0], [0], [1], [0, 0, 1, 1], [], []>} : vector<2x32xf32>, vector<32x32xf32>, vector<2x32xf32> -> vector<2x32xf32>
    %cst_26 = arith.constant dense<0.000000e+00> : vector<2x32xf32>
    %49 = tpu.matmul %47, %16, %cst_26 {dimension_numbers = #tpu.dot_dimension_numbers<[1], [0], [0], [1], [0, 0, 1, 1], [], []>} : vector<2x32xf32>, vector<32x32xf32>, vector<2x32xf32> -> vector<2x32xf32>
    %cst_27 = arith.constant dense<0.000000e+00> : vector<2x32xf32>
    %50 = tpu.matmul %47, %17, %cst_27 {dimension_numbers = #tpu.dot_dimension_numbers<[1], [0], [0], [1], [0, 0, 1, 1], [], []>} : vector<2x32xf32>, vector<32x32xf32>, vector<2x32xf32> -> vector<2x32xf32>
    %51 = vector.broadcast %18 : vector<1x32xf32> to vector<2x32xf32>
    %52 = arith.addf %50, %51 : vector<2x32xf32>
    %53 = vector.extract_strided_slice %12 {offsets = [2, 0], sizes = [2, 32], strides = [1, 1]} : vector<16x32xf32> to vector<2x32xf32>
    %54 = arith.addf %53, %48 : vector<2x32xf32>
    %55 = arith.negf %54 : vector<2x32xf32>
    %56 = math.exp %55 : vector<2x32xf32>
    %cst_28 = arith.constant 1.000000e+00 : f32
    %57 = vector.broadcast %cst_28 : f32 to vector<2x32xf32>
    %58 = arith.addf %57, %56 : vector<2x32xf32>
    %59 = arith.divf %57, %58 : vector<2x32xf32>
    %60 = vector.extract_strided_slice %13 {offsets = [2, 0], sizes = [2, 32], strides = [1, 1]} : vector<16x32xf32> to vector<2x32xf32>
    %61 = arith.addf %60, %49 : vector<2x32xf32>
    %62 = arith.negf %61 : vector<2x32xf32>
    %63 = math.exp %62 : vector<2x32xf32>
    %cst_29 = arith.constant 1.000000e+00 : f32
    %64 = vector.broadcast %cst_29 : f32 to vector<2x32xf32>
    %65 = arith.addf %64, %63 : vector<2x32xf32>
    %66 = arith.divf %64, %65 : vector<2x32xf32>
    %67 = vector.extract_strided_slice %14 {offsets = [2, 0], sizes = [2, 32], strides = [1, 1]} : vector<16x32xf32> to vector<2x32xf32>
    %68 = arith.mulf %59, %52 : vector<2x32xf32>
    %69 = arith.addf %67, %68 : vector<2x32xf32>
    %70 = math.tanh %69 : vector<2x32xf32>
    %cst_30 = arith.constant 1.000000e+00 : f32
    %71 = vector.broadcast %cst_30 : f32 to vector<2x32xf32>
    %72 = arith.subf %71, %66 : vector<2x32xf32>
    %73 = arith.mulf %72, %70 : vector<2x32xf32>
    %74 = arith.mulf %66, %47 : vector<2x32xf32>
    %75 = arith.addf %73, %74 : vector<2x32xf32>
    %cst_31 = arith.constant dense<0.000000e+00> : vector<2x32xf32>
    %76 = tpu.matmul %75, %15, %cst_31 {dimension_numbers = #tpu.dot_dimension_numbers<[1], [0], [0], [1], [0, 0, 1, 1], [], []>} : vector<2x32xf32>, vector<32x32xf32>, vector<2x32xf32> -> vector<2x32xf32>
    %cst_32 = arith.constant dense<0.000000e+00> : vector<2x32xf32>
    %77 = tpu.matmul %75, %16, %cst_32 {dimension_numbers = #tpu.dot_dimension_numbers<[1], [0], [0], [1], [0, 0, 1, 1], [], []>} : vector<2x32xf32>, vector<32x32xf32>, vector<2x32xf32> -> vector<2x32xf32>
    %cst_33 = arith.constant dense<0.000000e+00> : vector<2x32xf32>
    %78 = tpu.matmul %75, %17, %cst_33 {dimension_numbers = #tpu.dot_dimension_numbers<[1], [0], [0], [1], [0, 0, 1, 1], [], []>} : vector<2x32xf32>, vector<32x32xf32>, vector<2x32xf32> -> vector<2x32xf32>
    %79 = vector.broadcast %18 : vector<1x32xf32> to vector<2x32xf32>
    %80 = arith.addf %78, %79 : vector<2x32xf32>
    %81 = vector.extract_strided_slice %12 {offsets = [4, 0], sizes = [2, 32], strides = [1, 1]} : vector<16x32xf32> to vector<2x32xf32>
    %82 = arith.addf %81, %76 : vector<2x32xf32>
    %83 = arith.negf %82 : vector<2x32xf32>
    %84 = math.exp %83 : vector<2x32xf32>
    %cst_34 = arith.constant 1.000000e+00 : f32
    %85 = vector.broadcast %cst_34 : f32 to vector<2x32xf32>
    %86 = arith.addf %85, %84 : vector<2x32xf32>
    %87 = arith.divf %85, %86 : vector<2x32xf32>
    %88 = vector.extract_strided_slice %13 {offsets = [4, 0], sizes = [2, 32], strides = [1, 1]} : vector<16x32xf32> to vector<2x32xf32>
    %89 = arith.addf %88, %77 : vector<2x32xf32>
    %90 = arith.negf %89 : vector<2x32xf32>
    %91 = math.exp %90 : vector<2x32xf32>
    %cst_35 = arith.constant 1.000000e+00 : f32
    %92 = vector.broadcast %cst_35 : f32 to vector<2x32xf32>
    %93 = arith.addf %92, %91 : vector<2x32xf32>
    %94 = arith.divf %92, %93 : vector<2x32xf32>
    %95 = vector.extract_strided_slice %14 {offsets = [4, 0], sizes = [2, 32], strides = [1, 1]} : vector<16x32xf32> to vector<2x32xf32>
    %96 = arith.mulf %87, %80 : vector<2x32xf32>
    %97 = arith.addf %95, %96 : vector<2x32xf32>
    %98 = math.tanh %97 : vector<2x32xf32>
    %cst_36 = arith.constant 1.000000e+00 : f32
    %99 = vector.broadcast %cst_36 : f32 to vector<2x32xf32>
    %100 = arith.subf %99, %94 : vector<2x32xf32>
    %101 = arith.mulf %100, %98 : vector<2x32xf32>
    %102 = arith.mulf %94, %75 : vector<2x32xf32>
    %103 = arith.addf %101, %102 : vector<2x32xf32>
    %cst_37 = arith.constant dense<0.000000e+00> : vector<2x32xf32>
    %104 = tpu.matmul %103, %15, %cst_37 {dimension_numbers = #tpu.dot_dimension_numbers<[1], [0], [0], [1], [0, 0, 1, 1], [], []>} : vector<2x32xf32>, vector<32x32xf32>, vector<2x32xf32> -> vector<2x32xf32>
    %cst_38 = arith.constant dense<0.000000e+00> : vector<2x32xf32>
    %105 = tpu.matmul %103, %16, %cst_38 {dimension_numbers = #tpu.dot_dimension_numbers<[1], [0], [0], [1], [0, 0, 1, 1], [], []>} : vector<2x32xf32>, vector<32x32xf32>, vector<2x32xf32> -> vector<2x32xf32>
    %cst_39 = arith.constant dense<0.000000e+00> : vector<2x32xf32>
    %106 = tpu.matmul %103, %17, %cst_39 {dimension_numbers = #tpu.dot_dimension_numbers<[1], [0], [0], [1], [0, 0, 1, 1], [], []>} : vector<2x32xf32>, vector<32x32xf32>, vector<2x32xf32> -> vector<2x32xf32>
    %107 = vector.broadcast %18 : vector<1x32xf32> to vector<2x32xf32>
    %108 = arith.addf %106, %107 : vector<2x32xf32>
    %109 = vector.extract_strided_slice %12 {offsets = [6, 0], sizes = [2, 32], strides = [1, 1]} : vector<16x32xf32> to vector<2x32xf32>
    %110 = arith.addf %109, %104 : vector<2x32xf32>
    %111 = arith.negf %110 : vector<2x32xf32>
    %112 = math.exp %111 : vector<2x32xf32>
    %cst_40 = arith.constant 1.000000e+00 : f32
    %113 = vector.broadcast %cst_40 : f32 to vector<2x32xf32>
    %114 = arith.addf %113, %112 : vector<2x32xf32>
    %115 = arith.divf %113, %114 : vector<2x32xf32>
    %116 = vector.extract_strided_slice %13 {offsets = [6, 0], sizes = [2, 32], strides = [1, 1]} : vector<16x32xf32> to vector<2x32xf32>
    %117 = arith.addf %116, %105 : vector<2x32xf32>
    %118 = arith.negf %117 : vector<2x32xf32>
    %119 = math.exp %118 : vector<2x32xf32>
    %cst_41 = arith.constant 1.000000e+00 : f32
    %120 = vector.broadcast %cst_41 : f32 to vector<2x32xf32>
    %121 = arith.addf %120, %119 : vector<2x32xf32>
    %122 = arith.divf %120, %121 : vector<2x32xf32>
    %123 = vector.extract_strided_slice %14 {offsets = [6, 0], sizes = [2, 32], strides = [1, 1]} : vector<16x32xf32> to vector<2x32xf32>
    %124 = arith.mulf %115, %108 : vector<2x32xf32>
    %125 = arith.addf %123, %124 : vector<2x32xf32>
    %126 = math.tanh %125 : vector<2x32xf32>
    %cst_42 = arith.constant 1.000000e+00 : f32
    %127 = vector.broadcast %cst_42 : f32 to vector<2x32xf32>
    %128 = arith.subf %127, %122 : vector<2x32xf32>
    %129 = arith.mulf %128, %126 : vector<2x32xf32>
    %130 = arith.mulf %122, %103 : vector<2x32xf32>
    %131 = arith.addf %129, %130 : vector<2x32xf32>
    %cst_43 = arith.constant dense<0.000000e+00> : vector<2x32xf32>
    %132 = tpu.matmul %131, %15, %cst_43 {dimension_numbers = #tpu.dot_dimension_numbers<[1], [0], [0], [1], [0, 0, 1, 1], [], []>} : vector<2x32xf32>, vector<32x32xf32>, vector<2x32xf32> -> vector<2x32xf32>
    %cst_44 = arith.constant dense<0.000000e+00> : vector<2x32xf32>
    %133 = tpu.matmul %131, %16, %cst_44 {dimension_numbers = #tpu.dot_dimension_numbers<[1], [0], [0], [1], [0, 0, 1, 1], [], []>} : vector<2x32xf32>, vector<32x32xf32>, vector<2x32xf32> -> vector<2x32xf32>
    %cst_45 = arith.constant dense<0.000000e+00> : vector<2x32xf32>
    %134 = tpu.matmul %131, %17, %cst_45 {dimension_numbers = #tpu.dot_dimension_numbers<[1], [0], [0], [1], [0, 0, 1, 1], [], []>} : vector<2x32xf32>, vector<32x32xf32>, vector<2x32xf32> -> vector<2x32xf32>
    %135 = vector.broadcast %18 : vector<1x32xf32> to vector<2x32xf32>
    %136 = arith.addf %134, %135 : vector<2x32xf32>
    %137 = vector.extract_strided_slice %12 {offsets = [8, 0], sizes = [2, 32], strides = [1, 1]} : vector<16x32xf32> to vector<2x32xf32>
    %138 = arith.addf %137, %132 : vector<2x32xf32>
    %139 = arith.negf %138 : vector<2x32xf32>
    %140 = math.exp %139 : vector<2x32xf32>
    %cst_46 = arith.constant 1.000000e+00 : f32
    %141 = vector.broadcast %cst_46 : f32 to vector<2x32xf32>
    %142 = arith.addf %141, %140 : vector<2x32xf32>
    %143 = arith.divf %141, %142 : vector<2x32xf32>
    %144 = vector.extract_strided_slice %13 {offsets = [8, 0], sizes = [2, 32], strides = [1, 1]} : vector<16x32xf32> to vector<2x32xf32>
    %145 = arith.addf %144, %133 : vector<2x32xf32>
    %146 = arith.negf %145 : vector<2x32xf32>
    %147 = math.exp %146 : vector<2x32xf32>
    %cst_47 = arith.constant 1.000000e+00 : f32
    %148 = vector.broadcast %cst_47 : f32 to vector<2x32xf32>
    %149 = arith.addf %148, %147 : vector<2x32xf32>
    %150 = arith.divf %148, %149 : vector<2x32xf32>
    %151 = vector.extract_strided_slice %14 {offsets = [8, 0], sizes = [2, 32], strides = [1, 1]} : vector<16x32xf32> to vector<2x32xf32>
    %152 = arith.mulf %143, %136 : vector<2x32xf32>
    %153 = arith.addf %151, %152 : vector<2x32xf32>
    %154 = math.tanh %153 : vector<2x32xf32>
    %cst_48 = arith.constant 1.000000e+00 : f32
    %155 = vector.broadcast %cst_48 : f32 to vector<2x32xf32>
    %156 = arith.subf %155, %150 : vector<2x32xf32>
    %157 = arith.mulf %156, %154 : vector<2x32xf32>
    %158 = arith.mulf %150, %131 : vector<2x32xf32>
    %159 = arith.addf %157, %158 : vector<2x32xf32>
    %cst_49 = arith.constant dense<0.000000e+00> : vector<2x32xf32>
    %160 = tpu.matmul %159, %15, %cst_49 {dimension_numbers = #tpu.dot_dimension_numbers<[1], [0], [0], [1], [0, 0, 1, 1], [], []>} : vector<2x32xf32>, vector<32x32xf32>, vector<2x32xf32> -> vector<2x32xf32>
    %cst_50 = arith.constant dense<0.000000e+00> : vector<2x32xf32>
    %161 = tpu.matmul %159, %16, %cst_50 {dimension_numbers = #tpu.dot_dimension_numbers<[1], [0], [0], [1], [0, 0, 1, 1], [], []>} : vector<2x32xf32>, vector<32x32xf32>, vector<2x32xf32> -> vector<2x32xf32>
    %cst_51 = arith.constant dense<0.000000e+00> : vector<2x32xf32>
    %162 = tpu.matmul %159, %17, %cst_51 {dimension_numbers = #tpu.dot_dimension_numbers<[1], [0], [0], [1], [0, 0, 1, 1], [], []>} : vector<2x32xf32>, vector<32x32xf32>, vector<2x32xf32> -> vector<2x32xf32>
    %163 = vector.broadcast %18 : vector<1x32xf32> to vector<2x32xf32>
    %164 = arith.addf %162, %163 : vector<2x32xf32>
    %165 = vector.extract_strided_slice %12 {offsets = [10, 0], sizes = [2, 32], strides = [1, 1]} : vector<16x32xf32> to vector<2x32xf32>
    %166 = arith.addf %165, %160 : vector<2x32xf32>
    %167 = arith.negf %166 : vector<2x32xf32>
    %168 = math.exp %167 : vector<2x32xf32>
    %cst_52 = arith.constant 1.000000e+00 : f32
    %169 = vector.broadcast %cst_52 : f32 to vector<2x32xf32>
    %170 = arith.addf %169, %168 : vector<2x32xf32>
    %171 = arith.divf %169, %170 : vector<2x32xf32>
    %172 = vector.extract_strided_slice %13 {offsets = [10, 0], sizes = [2, 32], strides = [1, 1]} : vector<16x32xf32> to vector<2x32xf32>
    %173 = arith.addf %172, %161 : vector<2x32xf32>
    %174 = arith.negf %173 : vector<2x32xf32>
    %175 = math.exp %174 : vector<2x32xf32>
    %cst_53 = arith.constant 1.000000e+00 : f32
    %176 = vector.broadcast %cst_53 : f32 to vector<2x32xf32>
    %177 = arith.addf %176, %175 : vector<2x32xf32>
    %178 = arith.divf %176, %177 : vector<2x32xf32>
    %179 = vector.extract_strided_slice %14 {offsets = [10, 0], sizes = [2, 32], strides = [1, 1]} : vector<16x32xf32> to vector<2x32xf32>
    %180 = arith.mulf %171, %164 : vector<2x32xf32>
    %181 = arith.addf %179, %180 : vector<2x32xf32>
    %182 = math.tanh %181 : vector<2x32xf32>
    %cst_54 = arith.constant 1.000000e+00 : f32
    %183 = vector.broadcast %cst_54 : f32 to vector<2x32xf32>
    %184 = arith.subf %183, %178 : vector<2x32xf32>
    %185 = arith.mulf %184, %182 : vector<2x32xf32>
    %186 = arith.mulf %178, %159 : vector<2x32xf32>
    %187 = arith.addf %185, %186 : vector<2x32xf32>
    %cst_55 = arith.constant dense<0.000000e+00> : vector<2x32xf32>
    %188 = tpu.matmul %187, %15, %cst_55 {dimension_numbers = #tpu.dot_dimension_numbers<[1], [0], [0], [1], [0, 0, 1, 1], [], []>} : vector<2x32xf32>, vector<32x32xf32>, vector<2x32xf32> -> vector<2x32xf32>
    %cst_56 = arith.constant dense<0.000000e+00> : vector<2x32xf32>
    %189 = tpu.matmul %187, %16, %cst_56 {dimension_numbers = #tpu.dot_dimension_numbers<[1], [0], [0], [1], [0, 0, 1, 1], [], []>} : vector<2x32xf32>, vector<32x32xf32>, vector<2x32xf32> -> vector<2x32xf32>
    %cst_57 = arith.constant dense<0.000000e+00> : vector<2x32xf32>
    %190 = tpu.matmul %187, %17, %cst_57 {dimension_numbers = #tpu.dot_dimension_numbers<[1], [0], [0], [1], [0, 0, 1, 1], [], []>} : vector<2x32xf32>, vector<32x32xf32>, vector<2x32xf32> -> vector<2x32xf32>
    %191 = vector.broadcast %18 : vector<1x32xf32> to vector<2x32xf32>
    %192 = arith.addf %190, %191 : vector<2x32xf32>
    %193 = vector.extract_strided_slice %12 {offsets = [12, 0], sizes = [2, 32], strides = [1, 1]} : vector<16x32xf32> to vector<2x32xf32>
    %194 = arith.addf %193, %188 : vector<2x32xf32>
    %195 = arith.negf %194 : vector<2x32xf32>
    %196 = math.exp %195 : vector<2x32xf32>
    %cst_58 = arith.constant 1.000000e+00 : f32
    %197 = vector.broadcast %cst_58 : f32 to vector<2x32xf32>
    %198 = arith.addf %197, %196 : vector<2x32xf32>
    %199 = arith.divf %197, %198 : vector<2x32xf32>
    %200 = vector.extract_strided_slice %13 {offsets = [12, 0], sizes = [2, 32], strides = [1, 1]} : vector<16x32xf32> to vector<2x32xf32>
    %201 = arith.addf %200, %189 : vector<2x32xf32>
    %202 = arith.negf %201 : vector<2x32xf32>
    %203 = math.exp %202 : vector<2x32xf32>
    %cst_59 = arith.constant 1.000000e+00 : f32
    %204 = vector.broadcast %cst_59 : f32 to vector<2x32xf32>
    %205 = arith.addf %204, %203 : vector<2x32xf32>
    %206 = arith.divf %204, %205 : vector<2x32xf32>
    %207 = vector.extract_strided_slice %14 {offsets = [12, 0], sizes = [2, 32], strides = [1, 1]} : vector<16x32xf32> to vector<2x32xf32>
    %208 = arith.mulf %199, %192 : vector<2x32xf32>
    %209 = arith.addf %207, %208 : vector<2x32xf32>
    %210 = math.tanh %209 : vector<2x32xf32>
    %cst_60 = arith.constant 1.000000e+00 : f32
    %211 = vector.broadcast %cst_60 : f32 to vector<2x32xf32>
    %212 = arith.subf %211, %206 : vector<2x32xf32>
    %213 = arith.mulf %212, %210 : vector<2x32xf32>
    %214 = arith.mulf %206, %187 : vector<2x32xf32>
    %215 = arith.addf %213, %214 : vector<2x32xf32>
    %cst_61 = arith.constant dense<0.000000e+00> : vector<2x32xf32>
    %216 = tpu.matmul %215, %15, %cst_61 {dimension_numbers = #tpu.dot_dimension_numbers<[1], [0], [0], [1], [0, 0, 1, 1], [], []>} : vector<2x32xf32>, vector<32x32xf32>, vector<2x32xf32> -> vector<2x32xf32>
    %cst_62 = arith.constant dense<0.000000e+00> : vector<2x32xf32>
    %217 = tpu.matmul %215, %16, %cst_62 {dimension_numbers = #tpu.dot_dimension_numbers<[1], [0], [0], [1], [0, 0, 1, 1], [], []>} : vector<2x32xf32>, vector<32x32xf32>, vector<2x32xf32> -> vector<2x32xf32>
    %cst_63 = arith.constant dense<0.000000e+00> : vector<2x32xf32>
    %218 = tpu.matmul %215, %17, %cst_63 {dimension_numbers = #tpu.dot_dimension_numbers<[1], [0], [0], [1], [0, 0, 1, 1], [], []>} : vector<2x32xf32>, vector<32x32xf32>, vector<2x32xf32> -> vector<2x32xf32>
    %219 = vector.broadcast %18 : vector<1x32xf32> to vector<2x32xf32>
    %220 = arith.addf %218, %219 : vector<2x32xf32>
    %221 = vector.extract_strided_slice %12 {offsets = [14, 0], sizes = [2, 32], strides = [1, 1]} : vector<16x32xf32> to vector<2x32xf32>
    %222 = arith.addf %221, %216 : vector<2x32xf32>
    %223 = arith.negf %222 : vector<2x32xf32>
    %224 = math.exp %223 : vector<2x32xf32>
    %cst_64 = arith.constant 1.000000e+00 : f32
    %225 = vector.broadcast %cst_64 : f32 to vector<2x32xf32>
    %226 = arith.addf %225, %224 : vector<2x32xf32>
    %227 = arith.divf %225, %226 : vector<2x32xf32>
    %228 = vector.extract_strided_slice %13 {offsets = [14, 0], sizes = [2, 32], strides = [1, 1]} : vector<16x32xf32> to vector<2x32xf32>
    %229 = arith.addf %228, %217 : vector<2x32xf32>
    %230 = arith.negf %229 : vector<2x32xf32>
    %231 = math.exp %230 : vector<2x32xf32>
    %cst_65 = arith.constant 1.000000e+00 : f32
    %232 = vector.broadcast %cst_65 : f32 to vector<2x32xf32>
    %233 = arith.addf %232, %231 : vector<2x32xf32>
    %234 = arith.divf %232, %233 : vector<2x32xf32>
    %235 = vector.extract_strided_slice %14 {offsets = [14, 0], sizes = [2, 32], strides = [1, 1]} : vector<16x32xf32> to vector<2x32xf32>
    %236 = arith.mulf %227, %220 : vector<2x32xf32>
    %237 = arith.addf %235, %236 : vector<2x32xf32>
    %238 = math.tanh %237 : vector<2x32xf32>
    %cst_66 = arith.constant 1.000000e+00 : f32
    %239 = vector.broadcast %cst_66 : f32 to vector<2x32xf32>
    %240 = arith.subf %239, %234 : vector<2x32xf32>
    %241 = arith.mulf %240, %238 : vector<2x32xf32>
    %242 = arith.mulf %234, %215 : vector<2x32xf32>
    %243 = arith.addf %241, %242 : vector<2x32xf32>
    %244 = tpu.concatenate %47, %75, %103, %131, %159, %187, %215, %243 in 0 : vector<2x32xf32>, vector<2x32xf32>, vector<2x32xf32>, vector<2x32xf32>, vector<2x32xf32>, vector<2x32xf32>, vector<2x32xf32>, vector<2x32xf32> -> vector<16x32xf32>
    %245 = tpu.concatenate %243, %215, %187, %159, %131, %103, %75, %47 in 0 : vector<2x32xf32>, vector<2x32xf32>, vector<2x32xf32>, vector<2x32xf32>, vector<2x32xf32>, vector<2x32xf32>, vector<2x32xf32>, vector<2x32xf32> -> vector<16x32xf32>
    %c0_67 = arith.constant 0 : index
    %c0_68 = arith.constant 0 : index
    %246 = vector.load %arg10[%c0_67, %c0_68] : memref<32x32xf32, #tpu.memory_space<vmem>>, vector<32x32xf32>
    %cst_69 = arith.constant dense<0.000000e+00> : vector<16x32xf32>
    %247 = tpu.matmul %244, %246, %cst_69 {dimension_numbers = #tpu.dot_dimension_numbers<[1], [0], [0], [1], [0, 0, 1, 1], [], []>} : vector<16x32xf32>, vector<32x32xf32>, vector<16x32xf32> -> vector<16x32xf32>
    %c0_70 = arith.constant 0 : index
    %c0_71 = arith.constant 0 : index
    %248 = vector.load %arg11[%c0_70, %c0_71] : memref<32x32xf32, #tpu.memory_space<vmem>>, vector<32x32xf32>
    %cst_72 = arith.constant dense<0.000000e+00> : vector<16x32xf32>
    %249 = tpu.matmul %245, %248, %cst_72 {dimension_numbers = #tpu.dot_dimension_numbers<[1], [0], [0], [1], [0, 0, 1, 1], [], []>} : vector<16x32xf32>, vector<32x32xf32>, vector<16x32xf32> -> vector<16x32xf32>
    %250 = arith.addf %247, %249 : vector<16x32xf32>
    %c0_73 = arith.constant 0 : index
    %c0_74 = arith.constant 0 : index
    %251 = vector.load %arg12[%c0_73, %c0_74] : memref<1x32xf32, #tpu.memory_space<vmem>>, vector<1x32xf32>
    %252 = vector.broadcast %251 : vector<1x32xf32> to vector<16x32xf32>
    %253 = arith.addf %250, %252 : vector<16x32xf32>
    %254 = math.tanh %253 : vector<16x32xf32>
    %255 = vector.extract_strided_slice %254 {offsets = [0, 0], sizes = [2, 32], strides = [1, 1]} : vector<16x32xf32> to vector<2x32xf32>
    %256 = vector.extract_strided_slice %254 {offsets = [2, 0], sizes = [2, 32], strides = [1, 1]} : vector<16x32xf32> to vector<2x32xf32>
    %257 = arith.addf %255, %256 : vector<2x32xf32>
    %258 = vector.extract_strided_slice %254 {offsets = [4, 0], sizes = [2, 32], strides = [1, 1]} : vector<16x32xf32> to vector<2x32xf32>
    %259 = arith.addf %257, %258 : vector<2x32xf32>
    %260 = vector.extract_strided_slice %254 {offsets = [6, 0], sizes = [2, 32], strides = [1, 1]} : vector<16x32xf32> to vector<2x32xf32>
    %261 = arith.addf %259, %260 : vector<2x32xf32>
    %262 = vector.extract_strided_slice %254 {offsets = [8, 0], sizes = [2, 32], strides = [1, 1]} : vector<16x32xf32> to vector<2x32xf32>
    %263 = arith.addf %261, %262 : vector<2x32xf32>
    %264 = vector.extract_strided_slice %254 {offsets = [10, 0], sizes = [2, 32], strides = [1, 1]} : vector<16x32xf32> to vector<2x32xf32>
    %265 = arith.addf %263, %264 : vector<2x32xf32>
    %266 = vector.extract_strided_slice %254 {offsets = [12, 0], sizes = [2, 32], strides = [1, 1]} : vector<16x32xf32> to vector<2x32xf32>
    %267 = arith.addf %265, %266 : vector<2x32xf32>
    %268 = vector.extract_strided_slice %254 {offsets = [14, 0], sizes = [2, 32], strides = [1, 1]} : vector<16x32xf32> to vector<2x32xf32>
    %269 = arith.addf %267, %268 : vector<2x32xf32>
    %cst_75 = arith.constant 1.250000e-01 : f32
    %270 = vector.broadcast %cst_75 : f32 to vector<2x32xf32>
    %271 = arith.mulf %269, %270 : vector<2x32xf32>
    %c0_76 = arith.constant 0 : index
    %c0_77 = arith.constant 0 : index
    %272 = vector.load %arg13[%c0_76, %c0_77] : memref<32x16xf32, #tpu.memory_space<vmem>>, vector<32x16xf32>
    %cst_78 = arith.constant dense<0.000000e+00> : vector<2x16xf32>
    %273 = tpu.matmul %271, %272, %cst_78 {dimension_numbers = #tpu.dot_dimension_numbers<[1], [0], [0], [1], [0, 0, 1, 1], [], []>} : vector<2x32xf32>, vector<32x16xf32>, vector<2x16xf32> -> vector<2x16xf32>
    %c0_79 = arith.constant 0 : index
    %c0_80 = arith.constant 0 : index
    %274 = vector.load %arg14[%c0_79, %c0_80] : memref<1x16xf32, #tpu.memory_space<vmem>>, vector<1x16xf32>
    %275 = vector.broadcast %274 : vector<1x16xf32> to vector<2x16xf32>
    %276 = arith.addf %273, %275 : vector<2x16xf32>
    %277 = vector.extract_strided_slice %276 {offsets = [0, 0], sizes = [2, 8], strides = [1, 1]} : vector<2x16xf32> to vector<2x8xf32>
    %278 = vector.extract_strided_slice %276 {offsets = [0, 8], sizes = [2, 8], strides = [1, 1]} : vector<2x16xf32> to vector<2x8xf32>
    %c0_81 = arith.constant 0 : index
    %c0_82 = arith.constant 0 : index
    %279 = vector.load %arg1[%c0_81, %c0_82] : memref<2x8xf32, #tpu.memory_space<vmem>>, vector<2x8xf32>
    %cst_83 = arith.constant 5.000000e-01 : f32
    %280 = vector.broadcast %cst_83 : f32 to vector<2x8xf32>
    %281 = arith.mulf %280, %278 : vector<2x8xf32>
    %282 = math.exp %281 : vector<2x8xf32>
    %283 = arith.mulf %279, %282 : vector<2x8xf32>
    %284 = arith.addf %277, %283 : vector<2x8xf32>
    %285 = tpu.concatenate %277, %278, %284 in 1 : vector<2x8xf32>, vector<2x8xf32>, vector<2x8xf32> -> vector<2x24xf32>
    %c0_84 = arith.constant 0 : index
    %c0_85 = arith.constant 0 : index
    %286 = vector.load %arg15[%c0_84, %c0_85] : memref<2x24xf32, #tpu.memory_space<vmem>>, vector<2x24xf32>
    tpu.vector_store %arg15[%c0_84, %c0_85], %285 {strides = array<i32>} : memref<2x24xf32, #tpu.memory_space<vmem>>, vector<2x24xf32>,
    return
  }
}

</mosaic_0001>

<bundles_post_ra>
// kernel: tpu_custom_call.1
= control target key start
LH: loop header
LB: loop body
LE: loop exit
PB: predicated region body
PF: predicated region fallthrough
CT: control target
= control target key end

     0   :  { %20 = vsyncpa [#allocation3], 0  ;;  %s4474_s0 = inlined_call_operand.hbm [shape: f32[16,32], index: 0, kind: input, shape index: {}]   ;;  %s4475_s1 = inlined_call_operand.vmem [shape: f32[2,8], index: 1, kind: input, shape index: {}]   ;;  %s4476_s2 = inlined_call_operand.vmem [shape: f32[32,64], index: 2, kind: input, shape index: {}]   ;;  %s4477_s3 = inlined_call_operand.hbm [shape: f32[1,64], index: 3, kind: input, shape index: {}]   ;;  %s4478_s4 = inlined_call_operand.hbm [shape: f32[64,96], index: 4, kind: input, shape index: {}]   ;;  %s4479_s5 = inlined_call_operand.hbm [shape: f32[1,96], index: 5, kind: input, shape index: {}]   ;;  %s4480_s6 = inlined_call_operand.vmem [shape: f32[32,32], index: 6, kind: input, shape index: {}]   ;;  %s4481_s7 = inlined_call_operand.hbm [shape: f32[32,32], index: 7, kind: input, shape index: {}]   ;;  %s4482_s8 = inlined_call_operand.hbm [shape: f32[32,32], index: 8, kind: input, shape index: {}]   ;;  %s4483_s9 = inlined_call_operand.hbm [shape: f32[1,32], index: 9, kind: input, shape index: {}]   ;;  %s4484_s10 = inlined_call_operand.hbm [shape: f32[32,32], index: 10, kind: input, shape index: {}]   ;;  %s4485_s11 = inlined_call_operand.hbm [shape: f32[32,32], index: 11, kind: input, shape index: {}]   ;;  %s4486_s12 = inlined_call_operand.vmem [shape: f32[1,32], index: 12, kind: input, shape index: {}]   ;;  %s4487_s13 = inlined_call_operand.vmem [shape: f32[32,16], index: 13, kind: input, shape index: {}]   ;;  %s4488_s14 = inlined_call_operand.vmem [shape: f32[1,16], index: 14, kind: input, shape index: {}]   ;;  %s4489_s15 = inlined_call_operand.hbm [shape: f32[2,24], index: 15, kind: output, shape index: {}]  }
   0x1   :  { %21 = vsyncpa [#allocation6], 0 }
   0x2   :  { %22 = vsyncpa [#allocation9], 0 }
   0x3   :  { %23 = vsyncpa [#allocation12], 0 }
   0x4   :  { %24 = vsyncpa [#allocation15], 0 }
   0x5   :  { %25 = vsyncpa [#allocation4], 0  ;;  %s3845_s18 = smov [#allocation5]   ;;  %s3846_s20 = smov [#allocation8]  }
   0x6   :  { %s48_s19 = sshll.u32 %s3845_s18, 4  ;;  %s70_s21 = sshll.u32 %s3846_s20, 4  ;;  %s49_s19 = int_to_ptr.vmem [resolvable:$true] %s48_s19  ;;  %s71_s21 = int_to_ptr.vmem [resolvable:$true] %s70_s21 }
   0x7   :  { %s3613_s24 = scalar_lea.hbm %s4477_s3, 16 }
   0x8   :  { %p3614_p0 = scmp.ne.s32.totalorder %s4477_s3, %s3613_s24  ;;  %p3617_p1 = scmp.lt.u32.totalorder %s3613_s24, %s4477_s3 }
   0xa   :  { %p3619_p2 = pnand %p3617_p1, %p3614_p0 }
   0xc   :  { %3622 = shalt.err (!%p3619_p2)
}
   0xd   :  { %s3623_s29 = scalar_lea.vmem %s49_s19, 16  ;;  %s3627_s30 = scalar_lea.vmem %s49_s19, 32 }
   0xe   :  { %p3624_p3 = scmp.ne.s32.totalorder %s49_s19, %s3623_s29  ;;  %p3628_p4 = scmp.lt.s32.totalorder %s49_s19, %s49_s19 }
   0xf   :  { %p3629_p5 = scmp.lt.s32.totalorder %s3627_s30, %s3623_s29 }
  0x11   :  { %p3630_p6 = por %p3629_p5, %p3628_p4 }
  0x13   :  { %p3631_p7 = pnand %p3630_p6, %p3624_p3 }
  0x15   :  { %3634 = shalt.err (!%p3631_p7)
}
  0x16   :  { %51 = dma.hbm_to_vmem [thread:$0]  %s4477_s3, 16, %s49_s19, [#allocation6]  }
  0x17   :  { %s3635_s22 = scalar_lea.hbm %s4479_s5, 16 }
  0x18   :  { %p3636_p8 = scmp.ne.s32.totalorder %s4479_s5, %s3635_s22  ;;  %p3639_p9 = scmp.lt.u32.totalorder %s3635_s22, %s4479_s5 }
  0x1a   :  { %p3641_p10 = pnand %p3639_p9, %p3636_p8 }
  0x1c   :  { %3644 = shalt.err (!%p3641_p10)
}
  0x1d   :  { %s3645_s27 = scalar_lea.vmem %s71_s21, 16  ;;  %s3649_s28 = scalar_lea.vmem %s71_s21, 32 }
  0x1e   :  { %p3646_p11 = scmp.ne.s32.totalorder %s71_s21, %s3645_s27  ;;  %p3650_p12 = scmp.lt.s32.totalorder %s71_s21, %s71_s21 }
  0x1f   :  { %p3651_p13 = scmp.lt.s32.totalorder %s3649_s28, %s3645_s27 }
  0x21   :  { %p3652_p0 = por %p3651_p13, %p3650_p12 }
  0x23   :  { %p3653_p1 = pnand %p3652_p0, %p3646_p11 }
  0x25   :  { %3656 = shalt.err (!%p3653_p1)
}
  0x26   :  { %73 = dma.hbm_to_vmem [thread:$0]  %s4479_s5, 16, %s71_s21, [#allocation9]  }
  0x27   :  { %s3847_s29 = smov [#allocation11]   ;;  %s3848_s16 = smov [#allocation14]  }
  0x28   :  { %s93_s30 = sshll.u32 %s3847_s29, 4  ;;  %s115_s17 = sshll.u32 %s3848_s16, 4  ;;  %s94_s30 = int_to_ptr.vmem [resolvable:$true] %s93_s30  ;;  %s3969_s17 = int_to_ptr.vmem [resolvable:$true] %s115_s17 }
  0x29   :  { %s3657_s22 = scalar_lea.hbm %s4482_s8, 512 }
  0x2a   :  { %p3658_p2 = scmp.ne.s32.totalorder %s4482_s8, %s3657_s22  ;;  %p3661_p3 = scmp.lt.u32.totalorder %s3657_s22, %s4482_s8 }
  0x2c   :  { %p3663_p4 = pnand %p3661_p3, %p3658_p2 }
  0x2e   :  { %3666 = shalt.err (!%p3663_p4)
}
  0x2f   :  { %s3667_s5 = scalar_lea.vmem %s94_s30, 512  ;;  %p3672_p6 = scmp.lt.s32.totalorder %s94_s30, %s94_s30 }
  0x30   :  { %p3668_p5 = scmp.ne.s32.totalorder %s94_s30, %s3667_s5  ;;  %p3673_p7 = scmp.lt.s32.totalorder %s3667_s5, %s3667_s5 }
  0x32   :  { %p3674_p8 = por %p3673_p7, %p3672_p6 }
  0x34   :  { %p3675_p9 = pnand %p3674_p8, %p3668_p5 }
  0x36   :  { %3678 = shalt.err (!%p3675_p9)
}
  0x37   :  { %s3849_s21 = smov 128   ;;  %s3850_s27 = smov 8  }
  0x38   :  { %99 = dma.hbm_to_vmem [thread:$0]  %s4482_s8, 512, %s94_s30, [#allocation12], %s3849_s21, %s3849_s21, %s3850_s27  }
  0x39   :  { %s3679_s16 = scalar_lea.hbm %s4484_s10, 512 }
  0x3a   :  { %p3680_p10 = scmp.ne.s32.totalorder %s4484_s10, %s3679_s16  ;;  %p3683_p11 = scmp.lt.u32.totalorder %s3679_s16, %s4484_s10 }
  0x3c   :  { %p3685_p12 = pnand %p3683_p11, %p3680_p10 }
  0x3e   :  { %3688 = shalt.err (!%p3685_p12)
}
  0x3f   :  { %s3689_s24 = scalar_lea.vmem %s3969_s17, 512  ;;  %p3694_p0 = scmp.lt.s32.totalorder %s3969_s17, %s3969_s17 }
  0x40   :  { %p3690_p13 = scmp.ne.s32.totalorder %s3969_s17, %s3689_s24  ;;  %p3695_p1 = scmp.lt.s32.totalorder %s3689_s24, %s3689_s24 }
  0x42   :  { %p3696_p2 = por %p3695_p1, %p3694_p0 }
  0x44   :  { %p3697_p3 = pnand %p3696_p2, %p3690_p13 }
  0x46   :  { %3700 = shalt.err (!%p3697_p3)
}
  0x47   :  { %121 = dma.hbm_to_vmem [thread:$0]  %s4484_s10, 512, %s3969_s17, [#allocation15], %s3849_s21, %s3849_s21, %s3850_s27  }
  0x48   :  { %s3851_s25 = smov [#allocation2]   ;;  %s3852_s5 = smov [#allocation7]  }
  0x49   :  { %s31_s26 = sshll.u32 %s3851_s25, 4  ;;  %s57_s28 = sshll.u32 %s3852_s5, 4  ;;  %s32_s26 = int_to_ptr.vmem [resolvable:$true] %s31_s26  ;;  %s4006_s28 = int_to_ptr.vmem [resolvable:$true] %s57_s28 }
  0x4a   :  { %s3701_s29 = scalar_lea.hbm %s4474_s0, 256 }
  0x4b   :  { %p3702_p4 = scmp.ne.s32.totalorder %s4474_s0, %s3701_s29  ;;  %p3705_p5 = scmp.lt.u32.totalorder %s3701_s29, %s4474_s0 }
  0x4d   :  { %p3707_p6 = pnand %p3705_p5, %p3702_p4 }
  0x4f   :  { %3710 = shalt.err (!%p3707_p6)
}
  0x50   :  { %s3711_s10 = scalar_lea.vmem %s32_s26, 256  ;;  %p3716_p8 = scmp.lt.s32.totalorder %s32_s26, %s32_s26 }
  0x51   :  { %p3712_p7 = scmp.ne.s32.totalorder %s32_s26, %s3711_s10  ;;  %p3717_p9 = scmp.lt.s32.totalorder %s3711_s10, %s3711_s10 }
  0x53   :  { %p3718_p10 = por %p3717_p9, %p3716_p8 }
  0x55   :  { %p3719_p11 = pnand %p3718_p10, %p3712_p7 }
  0x57   :  { %3722 = shalt.err (!%p3719_p11)
}
  0x58   :  { %37 = dma.hbm_to_vmem [thread:$0]  %s4474_s0, 256, %s32_s26, [#allocation3], %s3849_s21, %s3849_s21, %s3850_s27  }
  0x59   :  { %s3723_s30 = scalar_lea.hbm %s4478_s4, 1024 }
  0x5a   :  { %p3724_p12 = scmp.ne.s32.totalorder %s4478_s4, %s3723_s30  ;;  %p3727_p13 = scmp.lt.u32.totalorder %s3723_s30, %s4478_s4 }
  0x5c   :  { %p3729_p0 = pnand %p3727_p13, %p3724_p12 }
  0x5e   :  { %3732 = shalt.err (!%p3729_p0)
}
  0x5f   :  { %s3733_s29 = scalar_lea.vmem %s4006_s28, 1024  ;;  %p3738_p2 = scmp.lt.s32.totalorder %s4006_s28, %s4006_s28 }
  0x60   :  { %p3734_p1 = scmp.ne.s32.totalorder %s4006_s28, %s3733_s29  ;;  %p3739_p3 = scmp.lt.s32.totalorder %s3733_s29, %s3733_s29 }
  0x62   :  { %p3740_p4 = por %p3739_p3, %p3738_p2 }
  0x64   :  { %p3741_p5 = pnand %p3740_p4, %p3734_p1 }
  0x66   :  { %3744 = shalt.err (!%p3741_p5)
}
  0x67   :  { %63 = dma.hbm_to_vmem [thread:$0]  %s4478_s4, 1024, %s4006_s28, [#allocation6], %s3849_s21, %s3849_s21, %s3850_s27  }
  0x68   :  { %s3853_s16 = smov [#allocation10]   ;;  %s3854_s20 = smov [#allocation13]  }
  0x69   :  { %s81_s18 = sshll.u32 %s3853_s16, 4  ;;  %s106_s22 = sshll.u32 %s3854_s20, 4  ;;  %s82_s18 = int_to_ptr.vmem [resolvable:$true] %s81_s18  ;;  %s107_s22 = int_to_ptr.vmem [resolvable:$true] %s106_s22 }
  0x6a   :  { %s3745_s23 = scalar_lea.hbm %s4481_s7, 512 }
  0x6b   :  { %p3746_p6 = scmp.ne.s32.totalorder %s4481_s7, %s3745_s23  ;;  %p3749_p7 = scmp.lt.u32.totalorder %s3745_s23, %s4481_s7 }
  0x6d   :  { %p3751_p8 = pnand %p3749_p7, %p3746_p6 }
  0x6f   :  { %3754 = shalt.err (!%p3751_p8)
}
  0x70   :  { %s3755_s4 = scalar_lea.vmem %s82_s18, 512  ;;  %p3760_p10 = scmp.lt.s32.totalorder %s82_s18, %s82_s18 }
  0x71   :  { %p3756_p9 = scmp.ne.s32.totalorder %s82_s18, %s3755_s4  ;;  %p3761_p11 = scmp.lt.s32.totalorder %s3755_s4, %s3755_s4 }
  0x73   :  { %p3762_p12 = por %p3761_p11, %p3760_p10 }
  0x75   :  { %p3763_p13 = pnand %p3762_p12, %p3756_p9 }
  0x77   :  { %3766 = shalt.err (!%p3763_p13)
}
  0x78   :  { %87 = dma.hbm_to_vmem [thread:$0]  %s4481_s7, 512, %s82_s18, [#allocation9], %s3849_s21, %s3849_s21, %s3850_s27  }
  0x79   :  { %s3767_s29 = scalar_lea.hbm %s4483_s9, 16 }
  0x7a   :  { %p3768_p0 = scmp.ne.s32.totalorder %s4483_s9, %s3767_s29  ;;  %p3771_p1 = scmp.lt.u32.totalorder %s3767_s29, %s4483_s9 }
  0x7c   :  { %p3773_p2 = pnand %p3771_p1, %p3768_p0 }
  0x7e   :  { %3776 = shalt.err (!%p3773_p2)
}
  0x7f   :  { %s3777_s10 = scalar_lea.vmem %s107_s22, 16  ;;  %s3781_s17 = scalar_lea.vmem %s107_s22, 32 }
  0x80   :  { %p3778_p3 = scmp.ne.s32.totalorder %s107_s22, %s3777_s10  ;;  %p3782_p4 = scmp.lt.s32.totalorder %s107_s22, %s107_s22 }
  0x81   :  { %p3783_p5 = scmp.lt.s32.totalorder %s3781_s17, %s3777_s10 }
  0x83   :  { %p3784_p6 = por %p3783_p5, %p3782_p4 }
  0x85   :  { %p3785_p7 = pnand %p3784_p6, %p3778_p3 }
  0x87   :  { %3788 = shalt.err (!%p3785_p7)
}
  0x88   :  { %109 = dma.hbm_to_vmem [thread:$0]  %s4483_s9, 16, %s107_s22, [#allocation12]  }
  0x89   :  { %s3855_s23 = smov [#allocation16]   ;;  %s3789_s25 = scalar_lea.hbm %s4485_s11, 512 }
  0x8a   :  { %s127_s24 = sshll.u32 %s3855_s23, 4  ;;  %p3790_p8 = scmp.ne.s32.totalorder %s4485_s11, %s3789_s25  ;;  %s128_s24 = int_to_ptr.vmem [resolvable:$true] %s127_s24 }
  0x8b   :  { %p3793_p9 = scmp.lt.u32.totalorder %s3789_s25, %s4485_s11 }
  0x8d   :  { %p3795_p10 = pnand %p3793_p9, %p3790_p8 }
  0x8f   :  { %3798 = shalt.err (!%p3795_p10)
}
  0x90   :  { %s3799_s19 = scalar_lea.vmem %s128_s24, 512  ;;  %p3804_p12 = scmp.lt.s32.totalorder %s128_s24, %s128_s24 }
  0x91   :  { %p3800_p11 = scmp.ne.s32.totalorder %s128_s24, %s3799_s19  ;;  %p3805_p13 = scmp.lt.s32.totalorder %s3799_s19, %s3799_s19 }
  0x93   :  { %p3806_p0 = por %p3805_p13, %p3804_p12 }
  0x95   :  { %p3807_p1 = pnand %p3806_p0, %p3800_p11 }
  0x97   :  { %3810 = shalt.err (!%p3807_p1)
}
  0x98   :  { %133 = dma.hbm_to_vmem [thread:$0]  %s4485_s11, 512, %s128_s24, [#allocation15], %s3849_s21, %s3849_s21, %s3850_s27  }
  0x99   :  { %3833 = dma.done.wait [#allocation3], 256  }
  0x9a   :  { %3834 = vsyncadd [#allocation3], 4294967040 }
  0x9b   :  { %3835 = dma.done.wait [#allocation6], 1040  }
  0x9c   :  { %3836 = vsyncadd [#allocation6], 4294966256 }
  0x9d   :  { %3837 = dma.done.wait [#allocation9], 528  }
  0x9e   :  { %3838 = vsyncadd [#allocation9], 4294966768 }
  0x9f   :  { %3839 = dma.done.wait [#allocation12], 528  }
  0xa0   :  { %3840 = vsyncadd [#allocation12], 4294966768 }
  0xa1   :  { %3841 = dma.done.wait [#allocation15], 1024  }
  0xa2   :  { %3842 = vsyncadd [#allocation15], 4294966272  ;;  %vm180_vm0 = vcmask 261120   ;;  %v169_v0 = vld [vmem:[%s4476_s2] sm:$0xff]  ;;  %v170_v1 = vld [vmem:[%s4476_s2 + $0x8] sm:$0xff]  ;;  %v3856_v18 = vmov 0.0|0.0  }
  0xa3   :  { %v171_v2 = vld [vmem:[%s4476_s2 + $0x10] sm:$0xff]  ;;  %v3311_v3 = vpack.c.bf16 %v170_v1, %v169_v0  ;;  %v172_v4 = vld [vmem:[%s4476_s2 + $0x18] sm:$0xff]  ;;  %v167_v5 = vld [vmem:[#allocation2] sm:$0xff]  ;;  %vm3857_vm1 = vmmov 0   ;;  %v3858_v27 = vmov 0.0   ;;  %vm279_vm2 = vcmask 523264  }
  0xa4   :  { %v3315_v6 = vpack.c.bf16 %v172_v4, %v171_v2  ;;  %2992 = vmatprep.mubr.msk.f32.mxu0 %vm180_vm0, %v167_v5  ;;  %v168_v7 = vld [vmem:[#allocation2 + $0x8] sm:$0xff]  ;;  %v264_v8 = vld [vmem:[#allocation7] sm:$0xff]  ;;  %v265_v9 = vld [vmem:[#allocation7 + $0x8] sm:$0xff]  ;;  %s3860_s30 = smov 32   ;;  %s3861_s25 = smov 96   ;;  %vm2422_vm3 = vcmask 1041408  }
  0xa5   :  { %3312 = vmatprep.subr.bf16.mxu0 %v3311_v3  ;;  %v3319_v10 = vpack.c.bf16 %v265_v9, %v264_v8  ;;  %v266_v11 = vld [vmem:[#allocation7 + $0x10] sm:$0xff]  ;;  %v267_v12 = vld [vmem:[#allocation7 + $0x18] sm:$0xff]  ;;  %v268_v14 = vld [vmem:[#allocation7 + $0x20] sm:$0xff]  ;;  %vm2424_vm4 = vcmask 1043456   ;;  %vm2426_vm5 = vcmask 1045504   ;;  %s3862_s16 = smov 120  }
  0xa6   :  { %3314 = vmatpush3.bf16.msra.mxu0 %v3311_v3  ;;  %v3323_v13 = vpack.c.bf16 %v267_v12, %v266_v11  ;;  %v269_v15 = vld [vmem:[#allocation7 + $0x28] sm:$0xff]  ;;  %v362_v19 = vld [vmem:[%s4480_s6 + $0x8] sm:$0xff]  ;;  %v363_v24 = vld [vmem:[%s4480_s6 + $0x10] sm:$0xff]  ;;  %s3863_s27 = smov 16   ;;  %s3864_s20 = smov [#allocation17]   ;;  %vm2757_vm6 = vcmask 130048  }
  0xa7   :  { %3316 = vmatprep.subr.bf16.mxu0 %v3315_v6  ;;  %3320 = vmatprep.subr.bf16.mxu1 %v3319_v10  ;;  %v361_v16 = vld [vmem:[%s4480_s6] sm:$0xff]  ;;  %v3327_v17 = vpack.c.bf16 %v269_v15, %v268_v14  ;;  %v271_v21 = vld [vmem:[#allocation7 + $0x38] sm:$0xff]  ;;  %v364_v25 = vld [vmem:[%s4480_s6 + $0x18] sm:$0xff]  ;;  %s3859_s6 = smov 64   ;;  %vm2759_vm7 = vcmask 189440  }
  0xa8   :  { %3322 = vmatpush3.bf16.msra.mxu1 %v3319_v10  ;;  %v270_v20 = vld [vmem:[#allocation7 + $0x30] sm:$0xff]  ;;  %v4106_v22 = vpack.c.bf16 %v362_v19, %v361_v16  ;;  %v4116_v26 = vpack.c.bf16 %v364_v25, %v363_v24  ;;  %v365_v28 = vld [vmem:[#allocation10] sm:$0xff]  ;;  %v368_v32 = vld [vmem:[#allocation10 + $0x18] sm:$0xff] }
  0xa9   :  { %3324 = vmatprep.subr.bf16.mxu1 %v3323_v13  ;;  %v3331_v23 = vpack.c.bf16 %v271_v21, %v270_v20  ;;  %v366_v29 = vld [vmem:[#allocation10 + $0x8] sm:$0xff]  ;;  %v367_v30 = vld [vmem:[#allocation10 + $0x10] sm:$0xff]  ;;  %v2780_v34 = vld [vmem:[#allocation5] ss:$0 sm:$0xff] }
  0xaa   :  { %3318 = vmatpush3.bf16.msra.mxu0 %v3315_v6  ;;  %v4126_v31 = vpack.c.bf16 %v366_v29, %v365_v28  ;;  %v4129_v33 = vpack.c.bf16 %v368_v32, %v367_v30  ;;  %v369_v39 = vld [vmem:[#allocation11] sm:$0xff]  ;;  %v370_v40 = vld [vmem:[#allocation11 + $0x8] sm:$0xff]  ;;  %v371_v43 = vld [vmem:[#allocation11 + $0x10] sm:$0xff] }
  0xab   :  { %3335 = vmatprep.subr.bf16.mxu0 %v3856_v18  ;;  %v4141_v41 = vpack.c.bf16 %v370_v40, %v369_v39  ;;  %v372_v44 = vld [vmem:[#allocation11 + $0x18] sm:$0xff]  ;;  %v4163_v62 = vld [vmem:[#allocation13] ss:$0 sm:$0xff] }
  0xac   :  { %3326 = vmatpush3.bf16.msra.mxu1 %v3323_v13  ;;  %v4144_v46 = vpack.c.bf16 %v372_v44, %v371_v43  ;;  %v2783_v51 = vld [vmem:[#allocation8] ss:$0 sm:$0xff] }
  0xad   :  { %2993 = vmatmul.mubr.msk.f32.vlgmr.msra.gmra.mrb[0].mxu0 %vm180_vm0, %v168_v7  ;;  %3328 = vmatprep.subr.bf16.mxu1 %v3327_v17 }
  0xae   :  { %3337 = vmatpush3.bf16.msra.mxu0 %v4106_v22  ;;  %3022 = vmatprep.mubr.msk.f32.mxu0 %vm3857_vm1, %v3858_v27 }
  0xaf   :  { %3338 = vmatprep.subr.bf16.mxu0 %v3856_v18 }
  0xb0   :  { %3330 = vmatpush3.bf16.msra.mxu1 %v3327_v17 }
  0xb1   :  { %3332 = vmatprep.subr.bf16.mxu1 %v3331_v23 }
  0xb2   :  { %3340 = vmatpush3.bf16.msra.mxu0 %v4116_v26 }
  0xb3   :  { %3341 = vmatprep.subr.bf16.mxu0 %v3856_v18 }
  0xb4   :  { %3334 = vmatpush3.bf16.msra.mxu1 %v3331_v23 }
  0xb5   :  { %3347 = vmatprep.subr.bf16.mxu1 %v3856_v18  ;;  %3023 = vmatmul.mubr.f32.vlgmr.msra.gmra.mrb[2].mxu0 %v3858_v27 }
  0xb6   :  { %3033 = vmatprep.mubr.msk.f32.mxu0 %vm3857_vm1, %v3858_v27  ;;  %3343 = vmatpush3.bf16.msra.mxu0 %v4126_v31 }
  0xb7   :  { %3344 = vmatprep.subr.bf16.mxu0 %v3856_v18 }
  0xba   :  { %3346 = vmatpush3.bf16.msra.mxu0 %v4129_v33 }
  0xbb   :  { %3353 = vmatprep.subr.bf16.mxu0 %v3856_v18 }
  0xbd   :  { %3034 = vmatmul.mubr.f32.vlgmr.msra.gmra.mrb[4].mxu0 %v3858_v27 }
  0xbe   :  { %3355 = vmatpush3.bf16.msra.mxu0 %v4106_v22  ;;  %3055 = vmatprep.mubr.msk.f32.mxu0 %vm3857_vm1, %v3858_v27 }
  0xbf   :  { %3356 = vmatprep.subr.bf16.mxu0 %v3856_v18 }
  0xc2   :  { %3358 = vmatpush3.bf16.msra.mxu0 %v4116_v26 }
  0xc3   :  { %3365 = vmatprep.subr.bf16.mxu0 %v3856_v18 }
 0x180   :  { %v2994_v35 = vpop.f32.mrb[0].mxu0 }
 0x181   :  { %v259_v36 = vadd.f32 %v2994_v35, %v2780_v34  ;;  %v253_v37 = vpop.f32.mrb[1].mxu0 }
 0x182   :  { %v254_v38 = vadd.f32 %v2780_v34, %v253_v37 }
 0x184   :  { %3523 = vtanh.f32 %v254_v38 }
 0x185   :  { %3525 = vtanh.f32 %v259_v36 }
 0x188   :  { %v443_v47 = vpop.f32.mrb[2].mxu0 }
 0x189   :  { %v3024_v48 = vpop.f32.mrb[3].mxu0 }
 0x18e   :  { %v3524_v42 = vpop.eup %3523 }
 0x18f   :  { %v3526_v45 = vpop.eup %3525  ;;  %3011 = vmatprep.mubr.msk.f32.mxu1 %vm279_vm2, %v3524_v42 }
 0x190   :  { %3012 = vmatmul.mubr.msk.f32.vlgmr.msra.gmra.mrb[0].mxu1 %vm279_vm2, %v3526_v45  ;;  %v513_v49 = vpop.f32.mrb[4].mxu0 }
 0x191   :  { %3349 = vmatpush3.bf16.msra.mxu1 %v4141_v41  ;;  %3044 = vmatprep.mubr.msk.f32.mxu1 %vm3857_vm1, %v3858_v27  ;;  %v3035_v50 = vpop.f32.mrb[5].mxu0 }
 0x192   :  { %3350 = vmatprep.subr.bf16.mxu1 %v3856_v18 }
 0x195   :  { %3352 = vmatpush3.bf16.msra.mxu1 %v4144_v46 }
 0x196   :  { %3359 = vmatprep.subr.bf16.mxu1 %v3856_v18 }
 0x198   :  { %3045 = vmatmul.mubr.f32.vlgmr.msra.gmra.mrb[2].mxu1 %v3858_v27 }
 0x199   :  { %3361 = vmatpush3.bf16.msra.mxu1 %v4126_v31  ;;  %3066 = vmatprep.mubr.msk.f32.mxu1 %vm3857_vm1, %v3858_v27 }
 0x19a   :  { %3362 = vmatprep.subr.bf16.mxu1 %v3856_v18 }
 0x19d   :  { %3364 = vmatpush3.bf16.msra.mxu1 %v4129_v33 }
 0x19e   :  { %3371 = vmatprep.subr.bf16.mxu1 %v3856_v18 }
 0x263   :  { %v3013_v52 = vpop.f32.mrb[0].mxu1 }
 0x264   :  { %v4158_v53 = vadd.f32 %v3013_v52, %v2783_v51  ;;  %v352_v54 = vpop.f32.mrb[1].mxu1 }
 0x265   :  { %v4160_v55 = vadd.f32 %v2783_v51, %v352_v54 }
 0x267   :  { %v593_v56 = vadd.f32 %v443_v47, %v4160_v55 }
 0x269   :  { %v2787_v57 = vmul.f32 -1.442695, %v593_v56 }
 0x26b   :  { %3527 = vpow2.f32 %v2787_v57  ;;  %v589_v58 = vpop.f32.mrb[2].mxu1 }
 0x26c   :  { %v3046_v59 = vpop.f32.mrb[3].mxu1  ;;  %v590_v63 = vadd.f32 %v4163_v62, %v589_v58 }
 0x275   :  { %v3528_v60 = vpop.eup %3527 }
 0x276   :  { %v597_v61 = vadd.f32 1.0, %v3528_v60 }
 0x278   :  { %3529 = vrcp.f32 %v597_v61 }
 0x282   :  { %v3530_v0 = vpop.eup %3529 }
 0x283   :  { %v611_v1 = vmul.f32 %v3530_v0, %v590_v63 }
 0x285   :  { %613 = vrot.lane.b32.xlu0 %v611_v1, %s3859_s6 }
 0x289   :  { %601 = vrot.lane.b32.xlu0 %v513_v49, %s3860_s30 }
 0x2f7   :  { %v614_v2 = vpop.permute.xlu0 %613 }
 0x2f8   :  { %v616_v3 = vadd.f32 %v614_v2, %v4160_v55 }
 0x2fa   :  { %3531 = vtanh.f32 %v616_v3 }
 0x2fb   :  { %v602_v5 = vpop.permute.xlu0 %601 }
 0x2fc   :  { %v604_v6 = vadd.f32 %v602_v5, %v4160_v55 }
 0x2fe   :  { %v2788_v7 = vmul.f32 -1.442695, %v604_v6 }
 0x300   :  { %3533 = vpow2.f32 %v2788_v7 }
 0x304   :  { %v3532_v4 = vpop.eup %3531 }
 0x305   :  { %620 = vrot.lane.b32.xlu1 %v3532_v4, %s3861_s25 }
 0x30a   :  { %v3534_v8 = vpop.eup %3533 }
 0x30b   :  { %v608_v9 = vadd.f32 1.0, %v3534_v8 }
 0x30d   :  { %3535 = vrcp.f32 %v608_v9 }
 0x317   :  { %v3536_v10 = vpop.eup %3535 }
 0x318   :  { %v618_v11 = vsub.f32 1.0, %v3536_v10  ;;  %v624_v14 = vmul.f32 0.0, %v3536_v10 }
 0x377   :  { %v621_v12 = vpop.permute.xlu1 %620 }
 0x378   :  { %v623_v13 = vmul.f32 %v621_v12, %v618_v11 }
 0x37a   :  { %v4171_v15 = vadd.f32 %v624_v14, %v623_v13 }
 0x37c   :  { %627 = vrot.lane.b32.xlu1 %v4171_v15, %s3861_s25  ;;  %v879_v51 = vrot.slane %v4171_v15, 6 }
 0x3ee   :  { %v628_v16 = vpop.permute.xlu1 %627 }
 0x3ef   :  { %3056 = vmatmul.mubr.msk.f32.vlgmr.msra.gmra.mrb[6].mxu0 %vm180_vm0, %v628_v16  ;;  %3067 = vmatmul.mubr.msk.f32.vlgmr.msra.gmra.mrb[4].mxu1 %vm180_vm0, %v628_v16 }
 0x3f0   :  { %3367 = vmatpush3.bf16.msra.mxu0 %v4141_v41  ;;  %3077 = vmatprep.mubr.msk.f32.mxu0 %vm3857_vm1, %v3858_v27 }
 0x3f1   :  { %3368 = vmatprep.subr.bf16.mxu0 %v3856_v18  ;;  %3373 = vmatpush3.bf16.msra.mxu1 %v4106_v22 }
 0x3f2   :  { %3374 = vmatprep.subr.bf16.mxu1 %v3856_v18  ;;  %3088 = vmatprep.mubr.msk.f32.mxu1 %vm3857_vm1, %v3858_v27 }
 0x3f4   :  { %3370 = vmatpush3.bf16.msra.mxu0 %v4144_v46 }
 0x3f5   :  { %3377 = vmatprep.subr.bf16.mxu0 %v3856_v18  ;;  %3376 = vmatpush3.bf16.msra.mxu1 %v4116_v26 }
 0x3f6   :  { %3383 = vmatprep.subr.bf16.mxu1 %v3856_v18 }
 0x3f7   :  { %3078 = vmatmul.mubr.msk.f32.vlgmr.msra.gmra.mrb[8].mxu0 %vm180_vm0, %v628_v16 }
 0x3f8   :  { %3379 = vmatpush3.bf16.msra.mxu0 %v4126_v31  ;;  %3099 = vmatprep.mubr.msk.f32.mxu0 %vm3857_vm1, %v3858_v27 }
 0x3f9   :  { %3380 = vmatprep.subr.bf16.mxu0 %v3856_v18 }
 0x3fc   :  { %3382 = vmatpush3.bf16.msra.mxu0 %v4129_v33 }
 0x3fd   :  { %3389 = vmatprep.subr.bf16.mxu0 %v3856_v18 }
 0x4c2   :  { %v697_v17 = vpop.f32.mrb[6].mxu0  ;;  %v767_v19 = vpop.f32.mrb[4].mxu1 }
 0x4c3   :  { %v842_v20 = vrot.slane %v697_v17, 6  ;;  %v852_v21 = vrot.slane %v767_v19, 6  ;;  %v3057_v23 = vpop.f32.mrb[7].mxu0  ;;  %v3068_v24 = vpop.f32.mrb[5].mxu1 }
 0x4c5   :  { %v844_v25 = vadd.f32 %v842_v20, %v4160_v55  ;;  %853 = vrot.lane.b32.xlu1 %v852_v21, %s3860_s30 }
 0x4c7   :  { %v2792_v28 = vmul.f32 -1.442695, %v844_v25 }
 0x4c9   :  { %3537 = vpow2.f32 %v2792_v28 }
 0x4ca   :  { %v837_v29 = vpop.f32.mrb[8].mxu0 }
 0x4cb   :  { %v3079_v30 = vpop.f32.mrb[9].mxu0  ;;  %v838_v35 = vadd.f32 %v4163_v62, %v837_v29 }
 0x4cd   :  { %v864_v36 = vrot.slane %v838_v35, 6 }
 0x4d3   :  { %v3538_v32 = vpop.eup %3537 }
 0x4d4   :  { %v848_v34 = vadd.f32 1.0, %v3538_v32 }
 0x4d6   :  { %3539 = vrcp.f32 %v848_v34 }
 0x4e0   :  { %v3540_v37 = vpop.eup %3539 }
 0x4e1   :  { %v866_v38 = vmul.f32 %v3540_v37, %v864_v36 }
 0x4e3   :  { %868 = vrot.lane.b32.xlu0 %v866_v38, %s3859_s6 }
 0x537   :  { %v854_v43 = vpop.permute.xlu1 %853 }
 0x538   :  { %v856_v44 = vadd.f32 %v854_v43, %v4160_v55 }
 0x53a   :  { %v2793_v45 = vmul.f32 -1.442695, %v856_v44 }
 0x555   :  { %v869_v39 = vpop.permute.xlu0 %868 }
 0x556   :  { %v871_v40 = vadd.f32 %v869_v39, %v4160_v55 }
 0x558   :  { %3541 = vtanh.f32 %v871_v40 }
 0x559   :  { %3543 = vpow2.f32 %v2793_v45 }
 0x562   :  { %v3542_v42 = vpop.eup %3541 }
 0x563   :  { %875 = vrot.lane.b32.xlu0 %v3542_v42, %s3861_s25  ;;  %v3544_v47 = vpop.eup %3543 }
 0x564   :  { %v860_v48 = vadd.f32 1.0, %v3544_v47 }
 0x566   :  { %3545 = vrcp.f32 %v860_v48 }
 0x570   :  { %v3546_v49 = vpop.eup %3545 }
 0x571   :  { %v873_v50 = vsub.f32 1.0, %v3546_v49  ;;  %v881_v56 = vmul.f32 %v3546_v49, %v879_v51 }
 0x5d5   :  { %v876_v52 = vpop.permute.xlu0 %875 }
 0x5d6   :  { %v878_v54 = vmul.f32 %v876_v52, %v873_v50 }
 0x5d8   :  { %v4204_v57 = vadd.f32 %v881_v56, %v878_v54 }
 0x5da   :  { %v884_v58 = vrot.slane %v4204_v57, 2  ;;  %v1137_v28 = vrot.slane %v4204_v57, 6  ;;  %v2423_v35 = vsel %vm2422_vm3, %v4171_v15, %v4204_v57 }
 0x5dc   :  { %885 = vrot.lane.b32.xlu1 %v884_v58, %s3861_s25 }
 0x64e   :  { %v886_v59 = vpop.permute.xlu1 %885 }
 0x64f   :  { %3089 = vmatmul.mubr.msk.f32.vlgmr.msra.gmra.mrb[6].mxu1 %vm180_vm0, %v886_v59  ;;  %3100 = vmatmul.mubr.msk.f32.vlgmr.msra.gmra.mrb[10].mxu0 %vm180_vm0, %v886_v59 }
 0x650   :  { %3385 = vmatpush3.bf16.msra.mxu1 %v4141_v41  ;;  %3110 = vmatprep.mubr.msk.f32.mxu1 %vm3857_vm1, %v3858_v27 }
 0x651   :  { %3386 = vmatprep.subr.bf16.mxu1 %v3856_v18  ;;  %3391 = vmatpush3.bf16.msra.mxu0 %v4106_v22 }
 0x652   :  { %3392 = vmatprep.subr.bf16.mxu0 %v3856_v18  ;;  %3121 = vmatprep.mubr.msk.f32.mxu0 %vm3857_vm1, %v3858_v27 }
 0x654   :  { %3388 = vmatpush3.bf16.msra.mxu1 %v4144_v46 }
 0x655   :  { %3395 = vmatprep.subr.bf16.mxu1 %v3856_v18  ;;  %3394 = vmatpush3.bf16.msra.mxu0 %v4116_v26 }
 0x656   :  { %3401 = vmatprep.subr.bf16.mxu0 %v3856_v18 }
 0x657   :  { %3111 = vmatmul.mubr.msk.f32.vlgmr.msra.gmra.mrb[8].mxu1 %vm180_vm0, %v886_v59 }
 0x658   :  { %3397 = vmatpush3.bf16.msra.mxu1 %v4126_v31  ;;  %3132 = vmatprep.mubr.msk.f32.mxu1 %vm3857_vm1, %v3858_v27 }
 0x659   :  { %3398 = vmatprep.subr.bf16.mxu1 %v3856_v18 }
 0x65c   :  { %3400 = vmatpush3.bf16.msra.mxu1 %v4129_v33 }
 0x65d   :  { %3407 = vmatprep.subr.bf16.mxu1 %v3856_v18 }
 0x722   :  { %v955_v60 = vpop.f32.mrb[6].mxu1  ;;  %v1025_v61 = vpop.f32.mrb[10].mxu0 }
 0x723   :  { %v1100_v63 = vrot.slane %v955_v60, 4  ;;  %v1110_v0 = vrot.slane %v1025_v61, 4  ;;  %v3090_v1 = vpop.f32.mrb[7].mxu1  ;;  %v3101_v2 = vpop.f32.mrb[11].mxu0 }
 0x725   :  { %v1102_v3 = vadd.f32 %v1100_v63, %v4160_v55  ;;  %1111 = vrot.lane.b32.xlu1 %v1110_v0, %s3860_s30 }
 0x727   :  { %v2797_v4 = vmul.f32 -1.442695, %v1102_v3 }
 0x729   :  { %3547 = vpow2.f32 %v2797_v4 }
 0x72a   :  { %v1095_v5 = vpop.f32.mrb[8].mxu1 }
 0x72b   :  { %v3112_v6 = vpop.f32.mrb[9].mxu1  ;;  %v1096_v9 = vadd.f32 %v4163_v62, %v1095_v5 }
 0x72d   :  { %v1122_v10 = vrot.slane %v1096_v9, 4 }
 0x733   :  { %v3548_v7 = vpop.eup %3547 }
 0x734   :  { %v1106_v8 = vadd.f32 1.0, %v3548_v7 }
 0x736   :  { %3549 = vrcp.f32 %v1106_v8 }
 0x740   :  { %v3550_v11 = vpop.eup %3549 }
 0x741   :  { %v1124_v12 = vmul.f32 %v3550_v11, %v1122_v10 }
 0x743   :  { %1126 = vrot.lane.b32.xlu0 %v1124_v12, %s3859_s6 }
 0x797   :  { %v1112_v17 = vpop.permute.xlu1 %1111 }
 0x798   :  { %v1114_v19 = vadd.f32 %v1112_v17, %v4160_v55 }
 0x79a   :  { %v2798_v20 = vmul.f32 -1.442695, %v1114_v19 }
 0x7b5   :  { %v1127_v13 = vpop.permute.xlu0 %1126 }
 0x7b6   :  { %v1129_v14 = vadd.f32 %v1127_v13, %v4160_v55 }
 0x7b8   :  { %3551 = vtanh.f32 %v1129_v14 }
 0x7b9   :  { %3553 = vpow2.f32 %v2798_v20 }
 0x7c2   :  { %v3552_v16 = vpop.eup %3551 }
 0x7c3   :  { %1133 = vrot.lane.b32.xlu0 %v3552_v16, %s3861_s25  ;;  %v3554_v21 = vpop.eup %3553 }
 0x7c4   :  { %v1118_v23 = vadd.f32 1.0, %v3554_v21 }
 0x7c6   :  { %3555 = vrcp.f32 %v1118_v23 }
 0x7d0   :  { %v3556_v24 = vpop.eup %3555 }
 0x7d1   :  { %v1131_v25 = vsub.f32 1.0, %v3556_v24  ;;  %v1139_v30 = vmul.f32 %v3556_v24, %v1137_v28 }
 0x835   :  { %v1134_v29 = vpop.permute.xlu0 %1133 }
 0x836   :  { %v1136_v32 = vmul.f32 %v1134_v29, %v1131_v25 }
 0x838   :  { %v4239_v34 = vadd.f32 %v1139_v30, %v1136_v32 }
 0x83a   :  { %v1142_v36 = vrot.slane %v4239_v34, 4  ;;  %v4247_v37 = vsel %vm2424_vm4, %v2423_v35, %v4239_v34  ;;  %v1395_v6 = vrot.slane %v4239_v34, 6 }
 0x83c   :  { %1143 = vrot.lane.b32.xlu1 %v1142_v36, %s3861_s25 }
 0x8ae   :  { %v1144_v38 = vpop.permute.xlu1 %1143 }
 0x8af   :  { %3122 = vmatmul.mubr.msk.f32.vlgmr.msra.gmra.mrb[12].mxu0 %vm180_vm0, %v1144_v38  ;;  %3133 = vmatmul.mubr.msk.f32.vlgmr.msra.gmra.mrb[10].mxu1 %vm180_vm0, %v1144_v38 }
 0x8b0   :  { %3403 = vmatpush3.bf16.msra.mxu0 %v4141_v41  ;;  %3143 = vmatprep.mubr.msk.f32.mxu0 %vm3857_vm1, %v3858_v27 }
 0x8b1   :  { %3404 = vmatprep.subr.bf16.mxu0 %v3856_v18  ;;  %3409 = vmatpush3.bf16.msra.mxu1 %v4106_v22 }
 0x8b2   :  { %3410 = vmatprep.subr.bf16.mxu1 %v3856_v18  ;;  %3154 = vmatprep.mubr.msk.f32.mxu1 %vm3857_vm1, %v3858_v27 }
 0x8b4   :  { %3406 = vmatpush3.bf16.msra.mxu0 %v4144_v46 }
 0x8b5   :  { %3413 = vmatprep.subr.bf16.mxu0 %v3856_v18  ;;  %3412 = vmatpush3.bf16.msra.mxu1 %v4116_v26 }
 0x8b6   :  { %3419 = vmatprep.subr.bf16.mxu1 %v3856_v18 }
 0x8b7   :  { %3144 = vmatmul.mubr.msk.f32.vlgmr.msra.gmra.mrb[14].mxu0 %vm180_vm0, %v1144_v38 }
 0x8b8   :  { %3415 = vmatpush3.bf16.msra.mxu0 %v4126_v31  ;;  %3165 = vmatprep.mubr.msk.f32.mxu0 %vm3857_vm1, %v3858_v27 }
 0x8b9   :  { %3416 = vmatprep.subr.bf16.mxu0 %v3856_v18 }
 0x8bc   :  { %3418 = vmatpush3.bf16.msra.mxu0 %v4129_v33 }
 0x8bd   :  { %3425 = vmatprep.subr.bf16.mxu0 %v3856_v18 }
 0x982   :  { %v1213_v39 = vpop.f32.mrb[12].mxu0  ;;  %v1283_v40 = vpop.f32.mrb[10].mxu1 }
 0x983   :  { %v1358_v42 = vrot.slane %v1213_v39, 2  ;;  %v1368_v43 = vrot.slane %v1283_v40, 2  ;;  %v3123_v44 = vpop.f32.mrb[13].mxu0  ;;  %v3134_v45 = vpop.f32.mrb[11].mxu1 }
 0x985   :  { %v1360_v47 = vadd.f32 %v1358_v42, %v4160_v55  ;;  %1369 = vrot.lane.b32.xlu1 %v1368_v43, %s3860_s30 }
 0x987   :  { %v2802_v48 = vmul.f32 -1.442695, %v1360_v47 }
 0x989   :  { %3557 = vpow2.f32 %v2802_v48 }
 0x98a   :  { %v1353_v49 = vpop.f32.mrb[14].mxu0 }
 0x98b   :  { %v3145_v50 = vpop.f32.mrb[15].mxu0  ;;  %v1354_v54 = vadd.f32 %v4163_v62, %v1353_v49 }
 0x98d   :  { %v1380_v56 = vrot.slane %v1354_v54, 2 }
 0x993   :  { %v3558_v51 = vpop.eup %3557 }
 0x994   :  { %v1364_v52 = vadd.f32 1.0, %v3558_v51 }
 0x996   :  { %3559 = vrcp.f32 %v1364_v52 }
 0x9a0   :  { %v3560_v58 = vpop.eup %3559 }
 0x9a1   :  { %v1382_v59 = vmul.f32 %v3560_v58, %v1380_v56 }
 0x9a3   :  { %1384 = vrot.lane.b32.xlu0 %v1382_v59, %s3859_s6 }
 0x9f7   :  { %v1370_v0 = vpop.permute.xlu1 %1369 }
 0x9f8   :  { %v1372_v1 = vadd.f32 %v1370_v0, %v4160_v55 }
 0x9fa   :  { %v2803_v2 = vmul.f32 -1.442695, %v1372_v1 }
 0xa15   :  { %v1385_v60 = vpop.permute.xlu0 %1384 }
 0xa16   :  { %v1387_v61 = vadd.f32 %v1385_v60, %v4160_v55 }
 0xa18   :  { %3561 = vtanh.f32 %v1387_v61 }
 0xa19   :  { %3563 = vpow2.f32 %v2803_v2 }
 0xa22   :  { %v3562_v63 = vpop.eup %3561 }
 0xa23   :  { %1391 = vrot.lane.b32.xlu0 %v3562_v63, %s3861_s25  ;;  %v3564_v3 = vpop.eup %3563 }
 0xa24   :  { %v1376_v4 = vadd.f32 1.0, %v3564_v3 }
 0xa26   :  { %3565 = vrcp.f32 %v1376_v4 }
 0xa30   :  { %v3566_v5 = vpop.eup %3565 }
 0xa31   :  { %v1389_v7 = vsub.f32 1.0, %v3566_v5  ;;  %v1397_v10 = vmul.f32 %v3566_v5, %v1395_v6 }
 0xa95   :  { %v1392_v8 = vpop.permute.xlu0 %1391 }
 0xa96   :  { %v1394_v9 = vmul.f32 %v1392_v8, %v1389_v7 }
 0xa98   :  { %v1398_v11 = vadd.f32 %v1397_v10, %v1394_v9 }
 0xa9a   :  { %v4279_v12 = vrot.slane %v1398_v11, 6  ;;  %v4283_v13 = vsel %vm2426_vm5, %v4247_v37, %v1398_v11 }
 0xa9c   :  { %1401 = vrot.lane.b32.xlu1 %v4279_v12, %s3861_s25 }
 0xb0e   :  { %v1402_v55 = vpop.permute.xlu1 %1401 }
 0xb0f   :  { %3155 = vmatmul.mubr.msk.f32.vlgmr.msra.gmra.mrb[12].mxu1 %vm180_vm0, %v1402_v55  ;;  %3166 = vmatmul.mubr.msk.f32.vlgmr.msra.gmra.mrb[16].mxu0 %vm180_vm0, %v1402_v55 }
 0xb10   :  { %3421 = vmatpush3.bf16.msra.mxu1 %v4141_v41  ;;  %3176 = vmatprep.mubr.msk.f32.mxu1 %vm3857_vm1, %v3858_v27 }
 0xb11   :  { %3422 = vmatprep.subr.bf16.mxu1 %v3856_v18  ;;  %3427 = vmatpush3.bf16.msra.mxu0 %v4106_v22 }
 0xb12   :  { %3428 = vmatprep.subr.bf16.mxu0 %v3856_v18  ;;  %3187 = vmatprep.mubr.msk.f32.mxu0 %vm3857_vm1, %v3858_v27 }
 0xb14   :  { %3424 = vmatpush3.bf16.msra.mxu1 %v4144_v46 }
 0xb15   :  { %3431 = vmatprep.subr.bf16.mxu1 %v3856_v18  ;;  %3430 = vmatpush3.bf16.msra.mxu0 %v4116_v26 }
 0xb16   :  { %3437 = vmatprep.subr.bf16.mxu0 %v3856_v18 }
 0xb17   :  { %3177 = vmatmul.mubr.msk.f32.vlgmr.msra.gmra.mrb[14].mxu1 %vm180_vm0, %v1402_v55 }
 0xb18   :  { %3433 = vmatpush3.bf16.msra.mxu1 %v4126_v31  ;;  %3198 = vmatprep.mubr.msk.f32.mxu1 %vm3857_vm1, %v3858_v27 }
 0xb19   :  { %3434 = vmatprep.subr.bf16.mxu1 %v3856_v18 }
 0xb1c   :  { %3436 = vmatpush3.bf16.msra.mxu1 %v4129_v33 }
 0xb1d   :  { %3443 = vmatprep.subr.bf16.mxu1 %v3856_v18 }
 0xbe2   :  { %v1471_v14 = vpop.f32.mrb[12].mxu1  ;;  %v1541_v16 = vpop.f32.mrb[16].mxu0 }
 0xbe3   :  { %v1615_v17 = vadd.f32 %v1471_v14, %v4158_v53  ;;  %1623 = vrot.lane.b32.xlu1 %v1541_v16, %s3860_s30  ;;  %v3156_v19 = vpop.f32.mrb[13].mxu1  ;;  %v3167_v20 = vpop.f32.mrb[17].mxu0 }
 0xbe5   :  { %v2807_v21 = vmul.f32 -1.442695, %v1615_v17 }
 0xbe7   :  { %3567 = vpow2.f32 %v2807_v21 }
 0xbea   :  { %v1611_v23 = vpop.f32.mrb[14].mxu1 }
 0xbeb   :  { %v3178_v24 = vpop.f32.mrb[15].mxu1  ;;  %v1612_v30 = vadd.f32 %v4163_v62, %v1611_v23 }
 0xbf1   :  { %v3568_v25 = vpop.eup %3567 }
 0xbf2   :  { %v1619_v29 = vadd.f32 1.0, %v3568_v25 }
 0xbf4   :  { %3569 = vrcp.f32 %v1619_v29 }
 0xbfe   :  { %v3570_v32 = vpop.eup %3569 }
 0xbff   :  { %v1633_v35 = vmul.f32 %v3570_v32, %v1612_v30 }
 0xc01   :  { %1635 = vrot.lane.b32.xlu0 %v1633_v35, %s3859_s6 }
 0xc55   :  { %v1624_v39 = vpop.permute.xlu1 %1623 }
 0xc56   :  { %v1626_v40 = vadd.f32 %v1624_v39, %v4158_v53 }
 0xc58   :  { %v2808_v42 = vmul.f32 -1.442695, %v1626_v40 }
 0xc73   :  { %v1636_v36 = vpop.permute.xlu0 %1635 }
 0xc74   :  { %v1638_v37 = vadd.f32 %v1636_v36, %v4158_v53 }
 0xc76   :  { %3571 = vtanh.f32 %v1638_v37 }
 0xc77   :  { %3573 = vpow2.f32 %v2808_v42 }
 0xc80   :  { %v3572_v38 = vpop.eup %3571 }
 0xc81   :  { %1642 = vrot.lane.b32.xlu0 %v3572_v38, %s3861_s25  ;;  %v3574_v43 = vpop.eup %3573 }
 0xc82   :  { %v1630_v44 = vadd.f32 1.0, %v3574_v43 }
 0xc84   :  { %3575 = vrcp.f32 %v1630_v44 }
 0xc8e   :  { %v3576_v45 = vpop.eup %3575 }
 0xc8f   :  { %v1640_v47 = vsub.f32 1.0, %v3576_v45  ;;  %v1647_v49 = vmul.f32 %v3576_v45, %v4279_v12 }
 0xcf3   :  { %v1643_v48 = vpop.permute.xlu0 %1642 }
 0xcf4   :  { %v1645_v50 = vmul.f32 %v1643_v48, %v1640_v47 }
 0xcf6   :  { %v4316_v51 = vadd.f32 %v1647_v49, %v1645_v50 }
 0xcf8   :  { %1650 = vrot.lane.b32.xlu1 %v4316_v51, %s3861_s25  ;;  %v1902_v23 = vrot.slane %v4316_v51, 6 }
 0xd6a   :  { %v1651_v52 = vpop.permute.xlu1 %1650 }
 0xd6b   :  { %3188 = vmatmul.mubr.msk.f32.vlgmr.msra.gmra.mrb[18].mxu0 %vm180_vm0, %v1651_v52  ;;  %3199 = vmatmul.mubr.msk.f32.vlgmr.msra.gmra.mrb[16].mxu1 %vm180_vm0, %v1651_v52 }
 0xd6c   :  { %3439 = vmatpush3.bf16.msra.mxu0 %v4141_v41  ;;  %3209 = vmatprep.mubr.msk.f32.mxu0 %vm3857_vm1, %v3858_v27 }
 0xd6d   :  { %3440 = vmatprep.subr.bf16.mxu0 %v3856_v18  ;;  %3445 = vmatpush3.bf16.msra.mxu1 %v4106_v22 }
 0xd6e   :  { %3446 = vmatprep.subr.bf16.mxu1 %v3856_v18  ;;  %3220 = vmatprep.mubr.msk.f32.mxu1 %vm3857_vm1, %v3858_v27 }
 0xd70   :  { %3442 = vmatpush3.bf16.msra.mxu0 %v4144_v46 }
 0xd71   :  { %3449 = vmatprep.subr.bf16.mxu0 %v3856_v18  ;;  %3448 = vmatpush3.bf16.msra.mxu1 %v4116_v26 }
 0xd72   :  { %3455 = vmatprep.subr.bf16.mxu1 %v3856_v18 }
 0xd73   :  { %3210 = vmatmul.mubr.msk.f32.vlgmr.msra.gmra.mrb[20].mxu0 %vm180_vm0, %v1651_v52 }
 0xd74   :  { %3451 = vmatpush3.bf16.msra.mxu0 %v4126_v31  ;;  %3231 = vmatprep.mubr.msk.f32.mxu0 %vm3857_vm1, %v3858_v27 }
 0xd75   :  { %3452 = vmatprep.subr.bf16.mxu0 %v3856_v18 }
 0xd78   :  { %3454 = vmatpush3.bf16.msra.mxu0 %v4129_v33 }
 0xd79   :  { %3461 = vmatprep.subr.bf16.mxu0 %v3856_v18 }
 0xe3e   :  { %v1720_v54 = vpop.f32.mrb[18].mxu0  ;;  %v1790_v56 = vpop.f32.mrb[16].mxu1 }
 0xe3f   :  { %v1865_v58 = vrot.slane %v1720_v54, 6  ;;  %v1875_v59 = vrot.slane %v1790_v56, 6  ;;  %v3189_v60 = vpop.f32.mrb[19].mxu0  ;;  %v3200_v61 = vpop.f32.mrb[17].mxu1 }
 0xe41   :  { %v1867_v63 = vadd.f32 %v1865_v58, %v4158_v53  ;;  %1876 = vrot.lane.b32.xlu1 %v1875_v59, %s3860_s30 }
 0xe43   :  { %v2812_v0 = vmul.f32 -1.442695, %v1867_v63 }
 0xe45   :  { %3577 = vpow2.f32 %v2812_v0 }
 0xe46   :  { %v1860_v1 = vpop.f32.mrb[20].mxu0 }
 0xe47   :  { %v3211_v2 = vpop.f32.mrb[21].mxu0  ;;  %v1861_v5 = vadd.f32 %v4163_v62, %v1860_v1 }
 0xe49   :  { %v1887_v6 = vrot.slane %v1861_v5, 6 }
 0xe4f   :  { %v3578_v3 = vpop.eup %3577 }
 0xe50   :  { %v1871_v4 = vadd.f32 1.0, %v3578_v3 }
 0xe52   :  { %3579 = vrcp.f32 %v1871_v4 }
 0xe5c   :  { %v3580_v7 = vpop.eup %3579 }
 0xe5d   :  { %v1889_v8 = vmul.f32 %v3580_v7, %v1887_v6 }
 0xe5f   :  { %1891 = vrot.lane.b32.xlu0 %v1889_v8, %s3859_s6 }
 0xeb3   :  { %v1877_v55 = vpop.permute.xlu1 %1876 }
 0xeb4   :  { %v1879_v14 = vadd.f32 %v1877_v55, %v4158_v53 }
 0xeb6   :  { %v2813_v16 = vmul.f32 -1.442695, %v1879_v14 }
 0xed1   :  { %v1892_v9 = vpop.permute.xlu0 %1891 }
 0xed2   :  { %v1894_v10 = vadd.f32 %v1892_v9, %v4158_v53 }
 0xed4   :  { %3581 = vtanh.f32 %v1894_v10 }
 0xed5   :  { %3583 = vpow2.f32 %v2813_v16 }
 0xede   :  { %v3582_v11 = vpop.eup %3581 }
 0xedf   :  { %1898 = vrot.lane.b32.xlu0 %v3582_v11, %s3861_s25  ;;  %v3584_v17 = vpop.eup %3583 }
 0xee0   :  { %v1883_v19 = vadd.f32 1.0, %v3584_v17 }
 0xee2   :  { %3585 = vrcp.f32 %v1883_v19 }
 0xeec   :  { %v3586_v20 = vpop.eup %3585 }
 0xeed   :  { %v1896_v21 = vsub.f32 1.0, %v3586_v20  ;;  %v1904_v29 = vmul.f32 %v3586_v20, %v1902_v23 }
 0xf51   :  { %v1899_v24 = vpop.permute.xlu0 %1898 }
 0xf52   :  { %v1901_v25 = vmul.f32 %v1899_v24, %v1896_v21 }
 0xf54   :  { %v4349_v30 = vadd.f32 %v1904_v29, %v1901_v25 }
 0xf56   :  { %v1907_v32 = vrot.slane %v4349_v30, 2  ;;  %v2160_v1 = vrot.slane %v4349_v30, 6  ;;  %v2428_v6 = vsel %vm2422_vm3, %v4316_v51, %v4349_v30 }
 0xf58   :  { %1908 = vrot.lane.b32.xlu1 %v1907_v32, %s3861_s25 }
 0xfca   :  { %v1909_v35 = vpop.permute.xlu1 %1908 }
 0xfcb   :  { %3221 = vmatmul.mubr.msk.f32.vlgmr.msra.gmra.mrb[18].mxu1 %vm180_vm0, %v1909_v35  ;;  %3232 = vmatmul.mubr.msk.f32.vlgmr.msra.gmra.mrb[22].mxu0 %vm180_vm0, %v1909_v35 }
 0xfcc   :  { %3457 = vmatpush3.bf16.msra.mxu1 %v4141_v41  ;;  %3242 = vmatprep.mubr.msk.f32.mxu1 %vm3857_vm1, %v3858_v27 }
 0xfcd   :  { %3458 = vmatprep.subr.bf16.mxu1 %v3856_v18  ;;  %3463 = vmatpush3.bf16.msra.mxu0 %v4106_v22 }
 0xfce   :  { %3464 = vmatprep.subr.bf16.mxu0 %v3856_v18  ;;  %3253 = vmatprep.mubr.msk.f32.mxu0 %vm3857_vm1, %v3858_v27 }
 0xfd0   :  { %3460 = vmatpush3.bf16.msra.mxu1 %v4144_v46 }
 0xfd1   :  { %3467 = vmatprep.subr.bf16.mxu1 %v3856_v18  ;;  %3466 = vmatpush3.bf16.msra.mxu0 %v4116_v26 }
 0xfd2   :  { %3473 = vmatprep.subr.bf16.mxu0 %v3856_v18 }
 0xfd3   :  { %3243 = vmatmul.mubr.msk.f32.vlgmr.msra.gmra.mrb[20].mxu1 %vm180_vm0, %v1909_v35 }
 0xfd4   :  { %3469 = vmatpush3.bf16.msra.mxu1 %v4126_v31  ;;  %3264 = vmatprep.mubr.msk.f32.mxu1 %vm3857_vm1, %v3858_v27 }
 0xfd5   :  { %3470 = vmatprep.subr.bf16.mxu1 %v3856_v18 }
 0xfd8   :  { %3472 = vmatpush3.bf16.msra.mxu1 %v4129_v33 }
0x109e   :  { %v1978_v22 = vpop.f32.mrb[18].mxu1  ;;  %v2048_v36 = vpop.f32.mrb[22].mxu0 }
0x109f   :  { %v2123_v37 = vrot.slane %v1978_v22, 4  ;;  %v2133_v38 = vrot.slane %v2048_v36, 4  ;;  %v3222_v39 = vpop.f32.mrb[19].mxu1  ;;  %v3233_v40 = vpop.f32.mrb[23].mxu0  ;;  %v2438_v22 = vrot.slane %v4239_v34, 2 }
0x10a0   :  { %v2453_v39 = vld [vmem:[#allocation16 + $0x8] sm:$0xff]  ;;  %v2440_v40 = vrot.slane %v4171_v15, 2 }
0x10a1   :  { %v2125_v26 = vadd.f32 %v2123_v37, %v4158_v53  ;;  %2134 = vrot.lane.b32.xlu1 %v2133_v38, %s3860_s30  ;;  %v2445_v36 = vsel %vm2422_vm3, %v4279_v12, %v2438_v22  ;;  %v2452_v38 = vld [vmem:[#allocation16] sm:$0xff] }
0x10a3   :  { %v2817_v42 = vmul.f32 -1.442695, %v2125_v26  ;;  %v3479_v26 = vpack.c.bf16 %v2453_v39, %v2452_v38  ;;  %v2829_v38 = vld [vmem:[%s4488_s14] ss:$0 sm:$0xff]  ;;  %s2767_s14 = sshll.u32 %s3864_s20, 4  ;;  %s2768_s14 = int_to_ptr.vmem [resolvable:$true] %s2767_s14 }
0x10a4   :  { %s3811_s2 = scalar_lea.vmem %s2768_s14, 32  ;;  %p3816_p3 = scmp.lt.s32.totalorder %s2768_s14, %s2768_s14 }
0x10a5   :  { %3587 = vpow2.f32 %v2817_v42  ;;  %3480 = vmatprep.subr.bf16.mxu1 %v3479_v26  ;;  %p3812_p2 = scmp.ne.s32.totalorder %s2768_s14, %s3811_s2  ;;  %p3817_p4 = scmp.lt.s32.totalorder %s3811_s2, %s3811_s2 }
0x10a6   :  { %v2118_v31 = vpop.f32.mrb[20].mxu1 }
0x10a7   :  { %v3244_v43 = vpop.f32.mrb[21].mxu1  ;;  %v2119_v47 = vadd.f32 %v4163_v62, %v2118_v31  ;;  %p3818_p5 = por %p3817_p4, %p3816_p3 }
0x10a9   :  { %v2145_v33 = vrot.slane %v2119_v47, 4  ;;  %v2448_v47 = vld [vmem:[#allocation14] sm:$0xff]  ;;  %p3819_p6 = pnand %p3818_p5, %p3812_p2 }
0x10af   :  { %v3588_v44 = vpop.eup %3587 }
0x10b0   :  { %v2129_v45 = vadd.f32 1.0, %v3588_v44  ;;  %v2455_v44 = vld [vmem:[#allocation16 + $0x18] sm:$0xff] }
0x10b2   :  { %3589 = vrcp.f32 %v2129_v45 }
0x10bc   :  { %v3590_v48 = vpop.eup %3589 }
0x10bd   :  { %v2147_v49 = vmul.f32 %v3590_v48, %v2145_v33  ;;  %v2449_v33 = vld [vmem:[#allocation14 + $0x8] sm:$0xff] }
0x10be   :  { %v3487_v48 = vpack.c.bf16 %v2449_v33, %v2448_v47 }
0x10bf   :  { %2149 = vrot.lane.b32.xlu0 %v2147_v49, %s3859_s6 }
0x1113   :  { %v2135_v56 = vpop.permute.xlu1 %2134 }
0x1114   :  { %v2137_v58 = vadd.f32 %v2135_v56, %v4158_v53 }
0x1116   :  { %v2818_v59 = vmul.f32 -1.442695, %v2137_v58 }
0x1131   :  { %v2150_v50 = vpop.permute.xlu0 %2149 }
0x1132   :  { %v2152_v52 = vadd.f32 %v2150_v50, %v4158_v53 }
0x1134   :  { %3591 = vtanh.f32 %v2152_v52 }
0x1135   :  { %3593 = vpow2.f32 %v2818_v59 }
0x113e   :  { %v3592_v54 = vpop.eup %3591 }
0x113f   :  { %2156 = vrot.lane.b32.xlu0 %v3592_v54, %s3861_s25  ;;  %v3594_v60 = vpop.eup %3593 }
0x1140   :  { %v2141_v61 = vadd.f32 1.0, %v3594_v60 }
0x1142   :  { %3595 = vrcp.f32 %v2141_v61  ;;  %v2436_v61 = vrot.slane %v4316_v51, 2 }
0x114c   :  { %v3596_v63 = vpop.eup %3595 }
0x114d   :  { %v2154_v0 = vsub.f32 1.0, %v3596_v63  ;;  %v2162_v3 = vmul.f32 %v3596_v63, %v2160_v1 }
0x11b1   :  { %v2157_v2 = vpop.permute.xlu0 %2156 }
0x11b2   :  { %v2159_v4 = vmul.f32 %v2157_v2, %v2154_v0 }
0x11b4   :  { %v4383_v5 = vadd.f32 %v2162_v3, %v2159_v4  ;;  %v2450_v3 = vld [vmem:[#allocation14 + $0x10] sm:$0xff]  ;;  %v2451_v4 = vld [vmem:[#allocation14 + $0x18] sm:$0xff] }
0x11b6   :  { %v2165_v7 = vrot.slane %v4383_v5, 4  ;;  %v4391_v8 = vsel %vm2424_vm4, %v2428_v6, %v4383_v5  ;;  %v2418_v49 = vrot.slane %v4383_v5, 6  ;;  %v2434_v58 = vrot.slane %v4383_v5, 2 }
0x11b7   :  { %v3491_v6 = vpack.c.bf16 %v2451_v4, %v2450_v3 }
0x11b8   :  { %2166 = vrot.lane.b32.xlu1 %v2165_v7, %s3861_s25 }
0x122a   :  { %v2167_v9 = vpop.permute.xlu1 %2166 }
0x122b   :  { %3254 = vmatmul.mubr.msk.f32.vlgmr.msra.gmra.mrb[24].mxu0 %vm180_vm0, %v2167_v9  ;;  %3265 = vmatmul.mubr.msk.f32.vlgmr.msra.gmra.mrb[22].mxu1 %vm180_vm0, %v2167_v9 }
0x122c   :  { %3475 = vmatpush3.bf16.msra.mxu0 %v4141_v41  ;;  %3275 = vmatprep.mubr.msk.f32.mxu0 %vm3857_vm1, %v3858_v27 }
0x122d   :  { %3476 = vmatprep.subr.bf16.mxu0 %v3856_v18  ;;  %3482 = vmatpush3.bf16.msra.mxu1 %v3479_v26 }
0x1230   :  { %3478 = vmatpush3.bf16.msra.mxu0 %v4144_v46 }
0x1231   :  { %3495 = vmatprep.subr.bf16.mxu0 %v3856_v18 }
0x1233   :  { %3276 = vmatmul.mubr.msk.f32.vlgmr.msra.gmra.mrb[26].mxu0 %vm180_vm0, %v2167_v9 }
0x1234   :  { %3308 = vmatprep.mubr.msk.f32.mxu0 %vm3857_vm1, %v3858_v27 }
0x12fe   :  { %v2236_v10 = vpop.f32.mrb[24].mxu0  ;;  %v2306_v11 = vpop.f32.mrb[22].mxu1 }
0x12ff   :  { %v2381_v55 = vrot.slane %v2236_v10, 2  ;;  %v2391_v14 = vrot.slane %v2306_v11, 2  ;;  %v3255_v16 = vpop.f32.mrb[25].mxu0  ;;  %v3266_v41 = vpop.f32.mrb[23].mxu1  ;;  %v2662_v10 = vld [vmem:[%s4487_s13 + $0x18] sm:$0xff] }
0x1301   :  { %v2383_v17 = vadd.f32 %v2381_v55, %v4158_v53  ;;  %2392 = vrot.lane.b32.xlu1 %v2391_v14, %s3860_s30  ;;  %v2828_v55 = vld [vmem:[%s4486_s12] ss:$0 sm:$0xff] }
0x1303   :  { %v2822_v19 = vmul.f32 -1.442695, %v2383_v17 }
0x1305   :  { %3597 = vpow2.f32 %v2822_v19 }
0x1306   :  { %v2376_v46 = vpop.f32.mrb[26].mxu0 }
0x1307   :  { %v3277_v20 = vpop.f32.mrb[27].mxu0  ;;  %v2377_v24 = vadd.f32 %v4163_v62, %v2376_v46  ;;  %v2446_v62 = vsel %vm2424_vm4, %v2445_v36, %v1137_v28  ;;  %v2454_v28 = vld [vmem:[#allocation16 + $0x10] sm:$0xff] }
0x1308   :  { %v2447_v42 = vsel %vm2426_vm5, %v2446_v62, %v2440_v40  ;;  %v3483_v45 = vpack.c.bf16 %v2455_v44, %v2454_v28 }
0x1309   :  { %v2403_v27 = vrot.slane %v2377_v24, 2 }
0x130a   :  { %3484 = vmatprep.subr.bf16.mxu1 %v3483_v45 }
0x130b   :  { %3486 = vmatpush3.bf16.msra.mxu1 %v3483_v45 }
0x130c   :  { %3488 = vmatprep.subr.bf16.mxu1 %v3487_v48 }
0x130f   :  { %v3598_v21 = vpop.eup %3597 }
0x1310   :  { %v2387_v23 = vadd.f32 1.0, %v3598_v21 }
0x1312   :  { %3599 = vrcp.f32 %v2387_v23 }
0x131c   :  { %v3600_v25 = vpop.eup %3599 }
0x131d   :  { %v2405_v29 = vmul.f32 %v3600_v25, %v2403_v27 }
0x131f   :  { %2407 = vrot.lane.b32.xlu0 %v2405_v29, %s3859_s6 }
0x1373   :  { %v2393_v34 = vpop.permute.xlu1 %2392 }
0x1374   :  { %v2395_v12 = vadd.f32 %v2393_v34, %v4158_v53 }
0x1376   :  { %v2823_v31 = vmul.f32 -1.442695, %v2395_v12 }
0x1391   :  { %v2408_v32 = vpop.permute.xlu0 %2407 }
0x1392   :  { %v2410_v35 = vadd.f32 %v2408_v32, %v4158_v53 }
0x1394   :  { %3601 = vtanh.f32 %v2410_v35 }
0x1395   :  { %3603 = vpow2.f32 %v2823_v31  ;;  %v2743_v31 = vld [vmem:[%s4475_s1] sm:$0x3] }
0x139e   :  { %v3602_v37 = vpop.eup %3601 }
0x139f   :  { %2414 = vrot.lane.b32.xlu0 %v3602_v37, %s3861_s25  ;;  %v3604_v43 = vpop.eup %3603 }
0x13a0   :  { %v2399_v57 = vadd.f32 1.0, %v3604_v43 }
0x13a2   :  { %3605 = vrcp.f32 %v2399_v57 }
0x13a3   :  { %2460 = vrot.lane.b32.xlu0 %v2447_v42, %s3861_s25 }
0x13ac   :  { %v3606_v15 = vpop.eup %3605 }
0x13ad   :  { %v2412_v50 = vsub.f32 1.0, %v3606_v15  ;;  %v2420_v54 = vmul.f32 %v3606_v15, %v2418_v49 }
0x1411   :  { %v2415_v52 = vpop.permute.xlu0 %2414 }
0x1412   :  { %v2417_v53 = vmul.f32 %v2415_v52, %v2412_v50 }
0x1414   :  { %v2421_v56 = vadd.f32 %v2420_v54, %v2417_v53 }
0x1415   :  { %v2461_v7 = vpop.permute.xlu0 %2460 }
0x1416   :  { %v2432_v59 = vrot.slane %v2421_v56, 6  ;;  %v2430_v60 = vsel %vm2426_vm5, %v4391_v8, %v2421_v56  ;;  %v2661_v8 = vld [vmem:[%s4487_s13 + $0x10] sm:$0xff] }
0x1417   :  { %2545 = vrot.lane.b32.xlu0 %v2430_v60, %s3861_s25  ;;  %v3499_v11 = vpack.c.bf16 %v2662_v10, %v2661_v8 }
0x1418   :  { %v2442_v63 = vsel %vm2422_vm3, %v2432_v59, %v2434_v58 }
0x1419   :  { %v2443_v0 = vsel %vm2424_vm4, %v2442_v63, %v2160_v1  ;;  %v2660_v1 = vld [vmem:[%s4487_s13 + $0x8] sm:$0xff] }
0x141a   :  { %v2444_v2 = vsel %vm2426_vm5, %v2443_v0, %v2436_v61 }
0x141b   :  { %2458 = vrot.lane.b32.xlu1 %v2444_v2, %s3861_s25 }
0x141f   :  { %2543 = vrot.lane.b32.xlu1 %v4283_v13, %s3861_s25  ;;  %v2659_v13 = vld [vmem:[%s4487_s13] sm:$0xff] }
0x1420   :  { %v3496_v9 = vpack.c.bf16 %v2660_v1, %v2659_v13 }
0x1422   :  { %3497 = vmatpush3.bf16.msra.mxu0 %v3496_v9 }
0x1423   :  { %3498 = vmatprep.subr.bf16.mxu0 %v3856_v18 }
0x1426   :  { %3500 = vmatpush3.bf16.msra.mxu0 %v3499_v11 }
0x1489   :  { %v2546_v30 = vpop.permute.xlu0 %2545 }
0x148d   :  { %v2459_v5 = vpop.permute.xlu1 %2458 }
0x148e   :  { %3286 = vmatprep.mubr.msk.f32.mxu1 %vm180_vm0, %v2459_v5 }
0x148f   :  { %3287 = vmatmul.mubr.msk.f32.vlgmr.msra.gmra.mrb[24].mxu1 %vm180_vm0, %v2461_v7 }
0x1490   :  { %3490 = vmatpush3.bf16.msra.mxu1 %v3487_v48 }
0x1491   :  { %v2544_v51 = vpop.permute.xlu1 %2543  ;;  %3492 = vmatprep.subr.bf16.mxu1 %v3491_v6 }
0x1492   :  { %3297 = vmatprep.mubr.msk.f32.mxu1 %vm180_vm0, %v2544_v51 }
0x1494   :  { %3494 = vmatpush3.bf16.msra.mxu1 %v3491_v6 }
0x1497   :  { %3298 = vmatmul.mubr.msk.f32.vlgmr.msra.gmra.mrb[24].mxu1 %vm180_vm0, %v2546_v30 }
0x156a   :  { %v3299_v14 = vpop.f32.mrb[24].mxu1 }
0x156b   :  { %v2617_v16 = vpop.f32.mrb[25].mxu1  ;;  %v2634_v17 = vadd.f32 %v3299_v14, %v2828_v55 }
0x156c   :  { %v2633_v41 = vadd.f32 %v2828_v55, %v2617_v16 }
0x156e   :  { %3607 = vtanh.f32 %v2633_v41 }
0x156f   :  { %3609 = vtanh.f32 %v2634_v17 }
0x1578   :  { %v3608_v19 = vpop.eup %3607 }
0x1579   :  { %v2638_v46 = vrot.slane %v3608_v19, 2  ;;  %v2641_v21 = vrot.slane %v3608_v19, 4  ;;  %v2644_v24 = vrot.slane %v3608_v19, 6  ;;  %v3610_v27 = vpop.eup %3609 }
0x157a   :  { %v2649_v29 = vrot.slane %v3610_v27, 2  ;;  %v2652_v35 = vrot.slane %v3610_v27, 4  ;;  %v2655_v36 = vrot.slane %v3610_v27, 6 }
0x157b   :  { %v2640_v20 = vadd.f32 %v3608_v19, %v2638_v46 }
0x157d   :  { %v2643_v23 = vadd.f32 %v2641_v21, %v2640_v20 }
0x157f   :  { %v2646_v25 = vadd.f32 %v2644_v24, %v2643_v23 }
0x1581   :  { %v2647_v18 = vadd.f32 %v3610_v27, %v2646_v25 }
0x1583   :  { %v2651_v32 = vadd.f32 %v2649_v29, %v2647_v18 }
0x1585   :  { %v2654_v22 = vadd.f32 %v2652_v35, %v2651_v32 }
0x1587   :  { %v2657_v37 = vadd.f32 %v2655_v36, %v2654_v22 }
0x1589   :  { %v2658_v62 = vmul.f32 0.125, %v2657_v37 }
0x158b   :  { %3309 = vmatmul.mubr.msk.f32.vlgmr.msra.gmra.mrb[28].mxu0 %vm180_vm0, %v2658_v62 }
0x165e   :  { %v2739_v39 = vpop.f32.mrb[28].mxu0 }
0x165f   :  { %v2740_v40 = vadd.f32 %v2829_v38, %v2739_v39  ;;  %v3310_v26 = vpop.f32.mrb[29].mxu0 }
0x1661   :  { %v2744_v42 = vmul.f32 0.5, %v2740_v40 }
0x1663   :  { %v2745_v34 = vmul.f32 1.442695, %v2744_v42 }
0x1665   :  { %3611 = vpow2.f32 %v2745_v34 }
0x166f   :  { %v3612_v12 = vpop.eup %3611 }
0x1670   :  { %2748 = vrot.lane.b32.xlu1 %v3612_v12, %s3862_s16 }
0x16e2   :  { %v2749_v43 = vpop.permute.xlu1 %2748 }
0x16e3   :  { %v2751_v57 = vmul.f32 %v2749_v43, %v2743_v31 }
0x16e5   :  { %v2752_v28 = vadd.f32 %v2751_v57, %v2740_v40 }
0x16e7   :  { %2754 = vrot.lane.b32.xlu0 %v2752_v28, %s3863_s27 }
0x1759   :  { %v2755_v44 = vpop.permute.xlu0 %2754 }
0x175a   :  { %v2758_v45 = vsel %vm2757_vm6, %v2740_v40, %v2755_v44 }
0x175b   :  { %2760 = vst.msk [vmem:[#allocation17] sm:$0x3] %vm2759_vm7, %v2758_v45 }
0x175c   :  { %3822 = shalt.err (!%p3819_p6)
}
0x175d   :  { %s3823_s17 = scalar_lea.hbm %s4489_s15, 32 }
0x175e   :  { %p3824_p7 = scmp.ne.s32.totalorder %s4489_s15, %s3823_s17  ;;  %p3827_p8 = scmp.lt.u32.totalorder %s3823_s17, %s4489_s15 }
0x1760   :  { %p3829_p9 = pnand %p3827_p8, %p3824_p7 }
0x1762   :  { %3832 = shalt.err (!%p3829_p9)
}
0x1763   :  { %2770 = dma.vmem_to_hbm [thread:$0]  %s2768_s14, 32, %s4489_s15, [#allocation4]  }
0x1764   :  { %3843 = dma.done.wait [#allocation4], 32  }
0x1765   :  { %3844 = vsyncadd [#allocation4], 4294967264 }
0x1766   :  { %2774 = vsyncpa [#allocation3], 1 }
0x1767   :  { %2775 = vsyncpa [#allocation6], 1 }
0x1768   :  { %2776 = vsyncpa [#allocation9], 1 }
0x1769   :  { %2777 = vsyncpa [#allocation12], 1 }
0x176a   :  { %2778 = vsyncpa [#allocation15], 1 }
0x176b   :  { %2779 = vsyncpa [#allocation4], 1 }

</bundles_post_ra>
